<compile_context>
chip_gen: v7x
topology: tpu7x:2x2x1
jax: 0.10.0
libtpu: 0.0.40
codegen_flags: <defaults>
</compile_context>

<pallas_src>
import functools

import jax
import jax.numpy as jnp
from jax.experimental import pallas as pl
from jax.experimental.pallas import tpu as pltpu


def _round_up(x, m):
    return ((x + m - 1) // m) * m


def _poly_conv_kernel(theta_ref, a_ref, u0_hbm, dinv2_ref, dsqrt_ref, *rest,
                      k_order, lin, precise, neg_slope, tm, tk):
    """Fused polynomial propagation + optional linear / leaky_relu tail.

    grid = (K-1, row_tiles, col_tiles), all axes sequential:
      kk : propagation step (u_{kk+1} needs the full u_kk -> sequential)
      i  : row tile of the (transposed) adjacency / output
      j  : contraction (column) tile of the adjacency

    Scratch:
      g_hi/g_lo : (2, Np, Fp) bf16 ping-pong holding u_k split into a bf16
                  hi/lo pair (rhs of the MXU matmuls, ~f32 accuracy combined)
      h_buf     : (Np, Fp) f32, running sum_k theta[k] * u_k
      acc_ref   : (tm, Fp) f32, per-row-tile contraction accumulator
    """
    if lin:
        w_ref, o_ref, g_hi, g_lo, h_buf, acc_ref = rest
    else:
        o_ref, g_hi, g_lo, h_buf, acc_ref = rest
        w_ref = None

    kk = pl.program_id(0)
    i = pl.program_id(1)
    j = pl.program_id(2)
    nj = pl.num_programs(2)
    last_kk = pl.num_programs(0) - 1

    row0 = pl.multiple_of(i * tm, tm)
    rows = pl.ds(row0, tm)

    # ---- one-time seed at the very first grid point --------------------------
    @pl.when((kk == 0) & (i == 0) & (j == 0))
    def _seed():
        # u0 = feat * D^-1/2 stays in HBM (memory_space=ANY) and is DMA'd once,
        # straight into the h' buffer so it never needs its own resident copy.
        pltpu.sync_copy(u0_hbm, h_buf)
        u0 = h_buf[...]
        hi = u0.astype(jnp.bfloat16)
        g_hi[0, :, :] = hi
        if precise:
            g_lo[0, :, :] = (u0 - hi.astype(jnp.float32)).astype(jnp.bfloat16)
        h_buf[...] = theta_ref[0] * u0            # h' = theta[0] * u0

    if k_order > 1:
        src = kk & 1                              # slot holding u_kk
        dst = (kk + 1) & 1                        # slot receiving u_{kk+1}
        col0 = pl.multiple_of(j * tk, tk)
        cols = pl.ds(col0, tk)

        @pl.when(j == 0)
        def _zero():
            acc_ref[...] = jnp.zeros_like(acc_ref)

        # acc += A_msg[i, j] @ u_kk[j].  A is streamed as int8 {0,1}, upcast to
        # bf16 so the MXU runs pure bf16 passes; the hi/lo split of u keeps the
        # product at ~f32 accuracy (products with {0,1} are exact, accumulation
        # is f32).
        a_bf = a_ref[...].astype(jnp.bfloat16)
        part = jnp.dot(a_bf, g_hi[src, cols, :],
                       preferred_element_type=jnp.float32)
        if precise:
            part = part + jnp.dot(a_bf, g_lo[src, cols, :],
                                  preferred_element_type=jnp.float32)
        acc_ref[...] += part

        @pl.when(j == nj - 1)
        def _update():
            # u_{kk+1}[i] = u_kk[i] - acc * D^-1 ;  h'[i] += theta[kk+1] * u_{kk+1}[i]
            if precise:
                u_old = (g_hi[src, rows, :].astype(jnp.float32)
                         + g_lo[src, rows, :].astype(jnp.float32))
            else:
                u_old = g_hi[src, rows, :].astype(jnp.float32)
            u_new = u_old - acc_ref[...] * dinv2_ref[rows, :]
            h_buf[rows, :] = h_buf[rows, :] + theta_ref[kk + 1] * u_new
            hi = u_new.astype(jnp.bfloat16)
            g_hi[dst, rows, :] = hi
            if precise:
                g_lo[dst, rows, :] = (u_new - hi.astype(jnp.float32)
                                      ).astype(jnp.bfloat16)

    # ---- emit this row tile only on the final propagation step ---------------
    @pl.when((kk == last_kk) & (j == nj - 1))
    def _emit():
        h_i = h_buf[rows, :] * dsqrt_ref[rows, :]        # back to unscaled domain
        if lin:
            y = jnp.dot(h_i, w_ref[...], preferred_element_type=jnp.float32)
            o_ref[...] = jnp.where(y >= 0.0, y, neg_slope * y)
        else:
            o_ref[...] = h_i


def poly_conv(adj, feat, theta, weight=None, lin=False, neg_slope=0.01,
              precise=True):
    """PolyConv forward.

    adj    : (N, N) dense adjacency, adj[u, v] = 1 for an edge u -> v.
    feat   : (N, F) node features.
    theta  : (K,) polynomial coefficients.
    weight : (out, in) Linear weight (used when lin=True; bias=False).
    precise: carry the scaled features as a bf16 hi/lo pair (two bf16 MXU
             passes, ~f32 accuracy).  False = single bf16 pass (~4e-3 rel err).
    """
    n, f = feat.shape
    assert adj.shape == (n, n)
    k_order = int(theta.shape[0])
    lin = bool(lin and weight is not None)
    out_dim = int(weight.shape[0]) if lin else f

    # ---- tiling: one big tile when the graph fits, else 512-wide tiles -------
    n128 = _round_up(n, 128)
    tile = n128 if n128 <= 1024 else 512
    n_pad = _round_up(n, tile)
    fp = _round_up(f, 128)                        # lane-dense feature width
    op = _round_up(out_dim, 128) if lin else fp   # lane-dense output width
    tm = tk = tile
    nk_g = max(k_order - 1, 1)
    ni = n_pad // tm
    nj = n_pad // tk

    # ---- host-side prep (padded, adjacency transposed to the msg operator) ---
    feat32 = feat.astype(jnp.float32)
    adj32 = adj.astype(jnp.float32)
    # copy_u/sum aggregates over incoming edges: h_out = A^T @ h, in-degree =
    # column sums of A.  Store the transposed operator so the kernel only ever
    # does plain (row-tile x col-tile) matmuls; int8 is exact for {0,1}.
    deg = jnp.maximum(jnp.sum(adj32, axis=0), 1.0)
    dinv = deg ** -0.5
    a_p = jnp.zeros((n_pad, n_pad), jnp.int8).at[:n, :n].set(
        adj32.T.astype(jnp.int8))
    u0_p = jnp.zeros((n_pad, fp), jnp.float32).at[:n, :f].set(
        feat32 * dinv[:, None])
    dinv2_p = jnp.ones((n_pad, 1), jnp.float32).at[:n, 0].set(dinv * dinv)
    dsqrt_p = jnp.ones((n_pad, 1), jnp.float32).at[:n, 0].set(1.0 / dinv)

    args = [theta.astype(jnp.float32), a_p, u0_p, dinv2_p, dsqrt_p]
    a_map = (lambda kk, i, j: (i, j)) if k_order > 1 else (lambda kk, i, j: (0, 0))
    in_specs = [
        pl.BlockSpec(memory_space=pltpu.MemorySpace.SMEM),   # theta (K,)
        pl.BlockSpec((tm, tk), a_map),                       # A^T tile, int8
        pl.BlockSpec(memory_space=pl.ANY),                   # u0: HBM, DMA'd once
        pl.BlockSpec((n_pad, 1), lambda kk, i, j: (0, 0)),   # D^-1, resident
        pl.BlockSpec((n_pad, 1), lambda kk, i, j: (0, 0)),   # D^+1/2, resident
    ]
    if lin:
        w_t = jnp.zeros((fp, op), jnp.float32).at[:f, :out_dim].set(
            weight.T.astype(jnp.float32))
        args.append(w_t)
        in_specs.append(pl.BlockSpec((fp, op), lambda kk, i, j: (0, 0)))

    # Output block pinned to row 0 for all but the last propagation step, so
    # only final (valid) tiles are ever written back to HBM.
    last = nk_g - 1
    out_spec = pl.BlockSpec(
        (tm, op), lambda kk, i, j: (jnp.where(kk == last, i, 0), 0))

    scratch_shapes = [
        pltpu.VMEM((2, n_pad, fp), jnp.bfloat16),   # u hi (scaled feats, ping-pong)
        pltpu.VMEM((2, n_pad, fp), jnp.bfloat16),   # u lo (f32 residual, ping-pong)
        pltpu.VMEM((n_pad, fp), jnp.float32),       # h' = sum_k theta[k] * u_k
        pltpu.VMEM((tm, fp), jnp.float32),          # contraction accumulator
    ]

    # ---- compiler params: raise scoped VMEM only when actually needed --------
    vmem_est = (2 * tm * tk                      # A tiles (int8, double-buffered)
                + 2 * 2 * n_pad * 4              # D vectors (double-buffered)
                + (2 * fp * op * 4 if lin else 0)  # W^T (double-buffered)
                + 2 * tm * op * 4                # output tile (double-buffered)
                + 2 * 2 * n_pad * fp * 2         # u hi/lo ping-pong (bf16)
                + n_pad * fp * 4                 # h'
                + tm * fp * 4                    # acc
                + tm * tk * 2 + 4 * tm * fp * 4  # per-step temporaries
                + n_pad * fp * 6)                # one-shot seed temporaries
    ck = dict(dimension_semantics=("arbitrary", "arbitrary", "arbitrary"))
    if vmem_est > (12 << 20):
        try:    # ~85% of physical VMEM (64 MiB on v7x, 128 MiB on v5e/v6e)
            cap = int(pltpu.get_tpu_info().vmem_capacity_bytes * 0.85)
        except Exception:
            cap = 54 << 20
        ck["vmem_limit_bytes"] = int(min(vmem_est + (8 << 20), cap))

    kernel = functools.partial(
        _poly_conv_kernel, k_order=k_order, lin=lin, precise=precise,
        neg_slope=neg_slope, tm=tm, tk=tk)

    out = pl.pallas_call(
        kernel,
        out_shape=jax.ShapeDtypeStruct((n_pad, op), jnp.float32),
        grid=(nk_g, ni, nj),
        in_specs=in_specs,
        out_specs=out_spec,
        scratch_shapes=scratch_shapes,
        compiler_params=pltpu.CompilerParams(**ck),
    )(*args)

    return out[:n, :out_dim]


def _reference(adj, feat, theta, weight, lin, neg_slope=0.01):
    adj = adj.astype(jnp.float32)
    feat = feat.astype(jnp.float32)
    deg = jnp.maximum(jnp.sum(adj, axis=0), 1.0)       # in-degrees, clamp(min=1)
    dinv = (deg ** -0.5).reshape(-1, 1)
    h = theta[0] * feat
    for k in range(1, theta.shape[0]):
        agg = jnp.dot(adj.T, feat * dinv, precision=jax.lax.Precision.HIGHEST)
        feat = feat - agg * dinv
        h = h + theta[k] * feat
    if lin:
        y = jnp.dot(h, weight.T, precision=jax.lax.Precision.HIGHEST)
        h = jnp.where(y >= 0, y, neg_slope * y)
    return h


if __name__ == "__main__":
    key = jax.random.PRNGKey(0)
    k_adj, k_feat, k_w = jax.random.split(key, 3)

    N = 64            # number of graph nodes
    IN_FEATS = 32
    OUT_FEATS = 32
    theta = jnp.array([0.5, 0.3, 0.2], dtype=jnp.float32)   # polynomial order K=3

    # deterministic synthetic undirected graph (symmetric, no self loops)
    a_rand = jax.random.bernoulli(k_adj, p=0.1, shape=(N, N)).astype(jnp.float32)
    adj = jnp.clip(a_rand + a_rand.T, 0.0, 1.0)
    adj = adj * (1.0 - jnp.eye(N, dtype=jnp.float32))

    feat = jax.random.normal(k_feat, (N, IN_FEATS), dtype=jnp.float32)

    # xavier_uniform_ for nn.Linear(in_feats, out_feats, bias=False): (out, in)
    bound = (6.0 / (IN_FEATS + OUT_FEATS)) ** 0.5
    weight = jax.random.uniform(
        k_w, (OUT_FEATS, IN_FEATS), dtype=jnp.float32, minval=-bound, maxval=bound)

    # lin=True path (propagation + fused linear + leaky_relu)
    out = jax.block_until_ready(poly_conv(adj, feat, theta, weight=weight, lin=True))
    ref = _reference(adj, feat, theta, weight, lin=True)
    assert out.shape == (N, OUT_FEATS)
    assert jnp.allclose(out, ref, atol=3e-4, rtol=3e-4), \
        float(jnp.abs(out - ref).max())

    # lin=False path (propagation only)
    out_nl = jax.block_until_ready(poly_conv(adj, feat, theta, lin=False))
    ref_nl = _reference(adj, feat, theta, weight, lin=False)
    assert out_nl.shape == (N, IN_FEATS)
    assert jnp.allclose(out_nl, ref_nl, atol=3e-4, rtol=3e-4), \
        float(jnp.abs(out_nl - ref_nl).max())

    print("KERNEL_OK")
</pallas_src>

<mosaic_0001>
module attributes {stable_mosaic.version = 11 : i64} {
  func.func @_poly_conv_kernel(%arg0: i32, %arg1: i32, %arg2: i32, %arg3: memref<3xf32, #tpu.memory_space<smem>>, %arg4: memref<128x128xi8, #tpu.memory_space<vmem>>, %arg5: memref<128x128xf32, #tpu.memory_space<any>>, %arg6: memref<128x1xf32, #tpu.memory_space<vmem>>, %arg7: memref<128x1xf32, #tpu.memory_space<vmem>>, %arg8: memref<128x128xf32, #tpu.memory_space<vmem>>, %arg9: memref<128x128xf32, #tpu.memory_space<vmem>>, %arg10: memref<2x128x128xbf16, #tpu.memory_space<vmem>>, %arg11: memref<2x128x128xbf16, #tpu.memory_space<vmem>>, %arg12: memref<128x128xf32, #tpu.memory_space<vmem>>, %arg13: memref<128x128xf32, #tpu.memory_space<vmem>>) attributes {dimension_semantics = [#tpu.dimension_semantics<arbitrary>, #tpu.dimension_semantics<arbitrary>, #tpu.dimension_semantics<arbitrary>], iteration_bounds = array<i64: 2, 1, 1>, scalar_prefetch = 0 : i64, scratch_operands = 4 : i64, tpu.core_type = #tpu.core_type<tc>, window_params = [{transform_indices = @transform_0, window_bounds = array<i64: 3>}, {transform_indices = @transform_1, window_bounds = array<i64: 128, 128>}, {}, {pipeline_mode = #tpu.pipeline_mode<synchronous>, transform_indices = @transform_3, window_bounds = array<i64: 128, 1>}, {pipeline_mode = #tpu.pipeline_mode<synchronous>, transform_indices = @transform_4, window_bounds = array<i64: 128, 1>}, {pipeline_mode = #tpu.pipeline_mode<synchronous>, transform_indices = @transform_5, window_bounds = array<i64: 128, 128>}, {transform_indices = @transform_6, window_bounds = array<i64: 128, 128>}]} {
    %c128_i32 = arith.constant 128 : i32
    %0 = arith.muli %arg1, %c128_i32 : i32
    %1 = tpu.assume_multiple %0, 128 : i32
    %c0_i32 = arith.constant 0 : i32
    %2 = arith.cmpi eq, %arg0, %c0_i32 : i32
    %c0_i32_0 = arith.constant 0 : i32
    %3 = arith.cmpi eq, %arg1, %c0_i32_0 : i32
    %4 = arith.andi %2, %3 : i1
    %c0_i32_1 = arith.constant 0 : i32
    %5 = arith.cmpi eq, %arg2, %c0_i32_1 : i32
    %6 = arith.andi %4, %5 : i1
    %7 = arith.extui %6 : i1 to i32
    %c0_i32_2 = arith.constant 0 : i32
    %8 = arith.cmpi ne, %7, %c0_i32_2 : i32
    scf.if %8 {
      "tpu.region"() ({
        %56 = tpu.sem_alloc : memref<!tpu.dma_semaphore, #tpu.memory_space<semaphore_mem>>
        tpu.enqueue_dma source(%arg5 : memref<128x128xf32, #tpu.memory_space<any>>) target(%arg12 : memref<128x128xf32, #tpu.memory_space<vmem>>) target_semaphore(%56 : memref<!tpu.dma_semaphore, #tpu.memory_space<semaphore_mem>>)
        tpu.wait_dma2 semaphore(%56 : memref<!tpu.dma_semaphore, #tpu.memory_space<semaphore_mem>>) src(%arg5 : memref<128x128xf32, #tpu.memory_space<any>>) dst(%arg12 : memref<128x128xf32, #tpu.memory_space<vmem>>)
        tpu.yield
      }) : () -> ()
      %c0_21 = arith.constant 0 : index
      %c0_22 = arith.constant 0 : index
      %41 = vector.load %arg12[%c0_21, %c0_22] : memref<128x128xf32, #tpu.memory_space<vmem>>, vector<128x128xf32>
      %42 = arith.truncf %41 : vector<128x128xf32> to vector<128x128xbf16>
      %c0_23 = arith.constant 0 : index
      %c0_24 = arith.constant 0 : index
      %c0_25 = arith.constant 0 : index
      %43 = vector.load %arg10[%c0_23, %c0_24, %c0_25] : memref<2x128x128xbf16, #tpu.memory_space<vmem>>, vector<1x128x128xbf16>
      %44 = vector.shape_cast %43 : vector<1x128x128xbf16> to vector<128x128xbf16>
      %45 = vector.shape_cast %42 : vector<128x128xbf16> to vector<1x128x128xbf16>
      tpu.vector_store %arg10[%c0_23, %c0_24, %c0_25], %45 {strides = array<i32>} : memref<2x128x128xbf16, #tpu.memory_space<vmem>>, vector<1x128x128xbf16>,
      %46 = arith.extf %42 : vector<128x128xbf16> to vector<128x128xf32>
      %47 = arith.subf %41, %46 : vector<128x128xf32>
      %48 = arith.truncf %47 : vector<128x128xf32> to vector<128x128xbf16>
      %c0_26 = arith.constant 0 : index
      %c0_27 = arith.constant 0 : index
      %c0_28 = arith.constant 0 : index
      %49 = vector.load %arg11[%c0_26, %c0_27, %c0_28] : memref<2x128x128xbf16, #tpu.memory_space<vmem>>, vector<1x128x128xbf16>
      %50 = vector.shape_cast %49 : vector<1x128x128xbf16> to vector<128x128xbf16>
      %51 = vector.shape_cast %48 : vector<128x128xbf16> to vector<1x128x128xbf16>
      tpu.vector_store %arg11[%c0_26, %c0_27, %c0_28], %51 {strides = array<i32>} : memref<2x128x128xbf16, #tpu.memory_space<vmem>>, vector<1x128x128xbf16>,
      %c0_29 = arith.constant 0 : index
      %52 = memref.load %arg3[%c0_29] : memref<3xf32, #tpu.memory_space<smem>>
      %53 = vector.broadcast %52 : f32 to vector<128x128xf32>
      %54 = arith.mulf %53, %41 : vector<128x128xf32>
      %c0_30 = arith.constant 0 : index
      %c0_31 = arith.constant 0 : index
      %55 = vector.load %arg12[%c0_30, %c0_31] : memref<128x128xf32, #tpu.memory_space<vmem>>, vector<128x128xf32>
      tpu.vector_store %arg12[%c0_30, %c0_31], %54 {strides = array<i32>} : memref<128x128xf32, #tpu.memory_space<vmem>>, vector<128x128xf32>,
    } else {
    }
    %c1_i32 = arith.constant 1 : i32
    %9 = arith.andi %arg0, %c1_i32 : i32
    %c1_i32_3 = arith.constant 1 : i32
    %10 = arith.addi %arg0, %c1_i32_3 : i32
    %c1_i32_4 = arith.constant 1 : i32
    %11 = arith.andi %10, %c1_i32_4 : i32
    %c128_i32_5 = arith.constant 128 : i32
    %12 = arith.muli %arg2, %c128_i32_5 : i32
    %13 = tpu.assume_multiple %12, 128 : i32
    %c0_i32_6 = arith.constant 0 : i32
    %14 = arith.cmpi eq, %arg2, %c0_i32_6 : i32
    %15 = arith.extui %14 : i1 to i32
    %c0_i32_7 = arith.constant 0 : i32
    %16 = arith.cmpi ne, %15, %c0_i32_7 : i32
    scf.if %16 {
      %cst_21 = arith.constant 0.000000e+00 : f32
      %41 = vector.broadcast %cst_21 : f32 to vector<128x128xf32>
      %c0_22 = arith.constant 0 : index
      %c0_23 = arith.constant 0 : index
      %42 = vector.load %arg13[%c0_22, %c0_23] : memref<128x128xf32, #tpu.memory_space<vmem>>, vector<128x128xf32>
      tpu.vector_store %arg13[%c0_22, %c0_23], %41 {strides = array<i32>} : memref<128x128xf32, #tpu.memory_space<vmem>>, vector<128x128xf32>,
    } else {
    }
    %c0 = arith.constant 0 : index
    %c0_8 = arith.constant 0 : index
    %17 = vector.load %arg4[%c0, %c0_8] : memref<128x128xi8, #tpu.memory_space<vmem>>, vector<128x128xi8>
    %18 = arith.sitofp %17 : vector<128x128xi8> to vector<128x128xbf16>
    %19 = arith.index_cast %9 : i32 to index
    %20 = arith.index_cast %13 : i32 to index
    %c0_9 = arith.constant 0 : index
    %21 = vector.load %arg10[%19, %20, %c0_9] : memref<2x128x128xbf16, #tpu.memory_space<vmem>>, vector<1x128x128xbf16>
    %22 = vector.shape_cast %21 : vector<1x128x128xbf16> to vector<128x128xbf16>
    %cst = arith.constant dense<0.000000e+00> : vector<128x128xf32>
    %23 = tpu.matmul %18, %22, %cst {dimension_numbers = #tpu.dot_dimension_numbers<[1], [0], [0], [1], [0, 0, 1, 1], [], []>} : vector<128x128xbf16>, vector<128x128xbf16>, vector<128x128xf32> -> vector<128x128xf32>
    %24 = arith.index_cast %9 : i32 to index
    %25 = arith.index_cast %13 : i32 to index
    %c0_10 = arith.constant 0 : index
    %26 = vector.load %arg11[%24, %25, %c0_10] : memref<2x128x128xbf16, #tpu.memory_space<vmem>>, vector<1x128x128xbf16>
    %27 = vector.shape_cast %26 : vector<1x128x128xbf16> to vector<128x128xbf16>
    %cst_11 = arith.constant dense<0.000000e+00> : vector<128x128xf32>
    %28 = tpu.matmul %18, %27, %cst_11 {dimension_numbers = #tpu.dot_dimension_numbers<[1], [0], [0], [1], [0, 0, 1, 1], [], []>} : vector<128x128xbf16>, vector<128x128xbf16>, vector<128x128xf32> -> vector<128x128xf32>
    %29 = arith.addf %23, %28 : vector<128x128xf32>
    %c0_12 = arith.constant 0 : index
    %c0_13 = arith.constant 0 : index
    %30 = vector.load %arg13[%c0_12, %c0_13] : memref<128x128xf32, #tpu.memory_space<vmem>>, vector<128x128xf32>
    %31 = arith.addf %30, %29 : vector<128x128xf32>
    %c0_14 = arith.constant 0 : index
    %c0_15 = arith.constant 0 : index
    %32 = vector.load %arg13[%c0_14, %c0_15] : memref<128x128xf32, #tpu.memory_space<vmem>>, vector<128x128xf32>
    tpu.vector_store %arg13[%c0_14, %c0_15], %31 {strides = array<i32>} : memref<128x128xf32, #tpu.memory_space<vmem>>, vector<128x128xf32>,
    %c0_i32_16 = arith.constant 0 : i32
    %33 = arith.cmpi eq, %arg2, %c0_i32_16 : i32
    %34 = arith.extui %33 : i1 to i32
    %c0_i32_17 = arith.constant 0 : i32
    %35 = arith.cmpi ne, %34, %c0_i32_17 : i32
    scf.if %35 {
      %41 = arith.index_cast %9 : i32 to index
      %42 = arith.index_cast %1 : i32 to index
      %c0_21 = arith.constant 0 : index
      %43 = vector.load %arg10[%41, %42, %c0_21] : memref<2x128x128xbf16, #tpu.memory_space<vmem>>, vector<1x128x128xbf16>
      %44 = vector.shape_cast %43 : vector<1x128x128xbf16> to vector<128x128xbf16>
      %45 = arith.extf %44 : vector<128x128xbf16> to vector<128x128xf32>
      %46 = arith.index_cast %9 : i32 to index
      %47 = arith.index_cast %1 : i32 to index
      %c0_22 = arith.constant 0 : index
      %48 = vector.load %arg11[%46, %47, %c0_22] : memref<2x128x128xbf16, #tpu.memory_space<vmem>>, vector<1x128x128xbf16>
      %49 = vector.shape_cast %48 : vector<1x128x128xbf16> to vector<128x128xbf16>
      %50 = arith.extf %49 : vector<128x128xbf16> to vector<128x128xf32>
      %51 = arith.addf %45, %50 : vector<128x128xf32>
      %c0_23 = arith.constant 0 : index
      %c0_24 = arith.constant 0 : index
      %52 = vector.load %arg13[%c0_23, %c0_24] : memref<128x128xf32, #tpu.memory_space<vmem>>, vector<128x128xf32>
      %53 = arith.index_cast %1 : i32 to index
      %c0_25 = arith.constant 0 : index
      %54 = vector.load %arg6[%53, %c0_25] : memref<128x1xf32, #tpu.memory_space<vmem>>, vector<128x1xf32>
      %55 = vector.broadcast %54 : vector<128x1xf32> to vector<128x128xf32>
      %56 = arith.mulf %52, %55 : vector<128x128xf32>
      %57 = arith.subf %51, %56 : vector<128x128xf32>
      %58 = arith.index_cast %1 : i32 to index
      %c0_26 = arith.constant 0 : index
      %59 = vector.load %arg12[%58, %c0_26] : memref<128x128xf32, #tpu.memory_space<vmem>>, vector<128x128xf32>
      %c1_i32_27 = arith.constant 1 : i32
      %60 = arith.addi %arg0, %c1_i32_27 : i32
      %61 = arith.index_cast %60 : i32 to index
      %62 = memref.load %arg3[%61] : memref<3xf32, #tpu.memory_space<smem>>
      %63 = vector.broadcast %62 : f32 to vector<128x128xf32>
      %64 = arith.mulf %63, %57 : vector<128x128xf32>
      %65 = arith.addf %59, %64 : vector<128x128xf32>
      %66 = arith.index_cast %1 : i32 to index
      %c0_28 = arith.constant 0 : index
      %67 = vector.load %arg12[%66, %c0_28] : memref<128x128xf32, #tpu.memory_space<vmem>>, vector<128x128xf32>
      tpu.vector_store %arg12[%66, %c0_28], %65 {strides = array<i32>} : memref<128x128xf32, #tpu.memory_space<vmem>>, vector<128x128xf32>,
      %68 = arith.truncf %57 : vector<128x128xf32> to vector<128x128xbf16>
      %69 = arith.index_cast %11 : i32 to index
      %70 = arith.index_cast %1 : i32 to index
      %c0_29 = arith.constant 0 : index
      %71 = vector.load %arg10[%69, %70, %c0_29] : memref<2x128x128xbf16, #tpu.memory_space<vmem>>, vector<1x128x128xbf16>
      %72 = vector.shape_cast %71 : vector<1x128x128xbf16> to vector<128x128xbf16>
      %73 = vector.shape_cast %68 : vector<128x128xbf16> to vector<1x128x128xbf16>
      tpu.vector_store %arg10[%69, %70, %c0_29], %73 {strides = array<i32>} : memref<2x128x128xbf16, #tpu.memory_space<vmem>>, vector<1x128x128xbf16>,
      %74 = arith.extf %68 : vector<128x128xbf16> to vector<128x128xf32>
      %75 = arith.subf %57, %74 : vector<128x128xf32>
      %76 = arith.truncf %75 : vector<128x128xf32> to vector<128x128xbf16>
      %77 = arith.index_cast %11 : i32 to index
      %78 = arith.index_cast %1 : i32 to index
      %c0_30 = arith.constant 0 : index
      %79 = vector.load %arg11[%77, %78, %c0_30] : memref<2x128x128xbf16, #tpu.memory_space<vmem>>, vector<1x128x128xbf16>
      %80 = vector.shape_cast %79 : vector<1x128x128xbf16> to vector<128x128xbf16>
      %81 = vector.shape_cast %76 : vector<128x128xbf16> to vector<1x128x128xbf16>
      tpu.vector_store %arg11[%77, %78, %c0_30], %81 {strides = array<i32>} : memref<2x128x128xbf16, #tpu.memory_space<vmem>>, vector<1x128x128xbf16>,
    } else {
    }
    %c1_i32_18 = arith.constant 1 : i32
    %36 = arith.cmpi eq, %arg0, %c1_i32_18 : i32
    %c0_i32_19 = arith.constant 0 : i32
    %37 = arith.cmpi eq, %arg2, %c0_i32_19 : i32
    %38 = arith.andi %36, %37 : i1
    %39 = arith.extui %38 : i1 to i32
    %c0_i32_20 = arith.constant 0 : i32
    %40 = arith.cmpi ne, %39, %c0_i32_20 : i32
    scf.if %40 {
      %41 = arith.index_cast %1 : i32 to index
      %c0_21 = arith.constant 0 : index
      %42 = vector.load %arg12[%41, %c0_21] : memref<128x128xf32, #tpu.memory_space<vmem>>, vector<128x128xf32>
      %43 = arith.index_cast %1 : i32 to index
      %c0_22 = arith.constant 0 : index
      %44 = vector.load %arg7[%43, %c0_22] : memref<128x1xf32, #tpu.memory_space<vmem>>, vector<128x1xf32>
      %45 = vector.broadcast %44 : vector<128x1xf32> to vector<128x128xf32>
      %46 = arith.mulf %42, %45 : vector<128x128xf32>
      %c0_23 = arith.constant 0 : index
      %c0_24 = arith.constant 0 : index
      %47 = vector.load %arg8[%c0_23, %c0_24] : memref<128x128xf32, #tpu.memory_space<vmem>>, vector<128x128xf32>
      %cst_25 = arith.constant dense<0.000000e+00> : vector<128x128xf32>
      %48 = tpu.matmul %46, %47, %cst_25 {dimension_numbers = #tpu.dot_dimension_numbers<[1], [0], [0], [1], [0, 0, 1, 1], [], []>} : vector<128x128xf32>, vector<128x128xf32>, vector<128x128xf32> -> vector<128x128xf32>
      %cst_26 = arith.constant 0.000000e+00 : f32
      %49 = vector.broadcast %cst_26 : f32 to vector<128x128xf32>
      %50 = arith.cmpf oge, %48, %49 : vector<128x128xf32>
      %cst_27 = arith.constant 0.00999999977 : f32
      %51 = vector.broadcast %cst_27 : f32 to vector<128x128xf32>
      %52 = arith.mulf %51, %48 : vector<128x128xf32>
      %53 = arith.select %50, %48, %52 : vector<128x128xi1>, vector<128x128xf32>
      %c0_28 = arith.constant 0 : index
      %c0_29 = arith.constant 0 : index
      %54 = vector.load %arg9[%c0_28, %c0_29] : memref<128x128xf32, #tpu.memory_space<vmem>>, vector<128x128xf32>
      tpu.vector_store %arg9[%c0_28, %c0_29], %53 {strides = array<i32>} : memref<128x128xf32, #tpu.memory_space<vmem>>, vector<128x128xf32>,
    } else {
    }
    return
  }
  func.func @transform_0(%arg0: i32, %arg1: i32, %arg2: i32) -> i32 {
    %c0_i32 = arith.constant 0 : i32
    %c0_i32_0 = arith.constant 0 : i32
    return %c0_i32 : i32
  }
  func.func @transform_1(%arg0: i32, %arg1: i32, %arg2: i32) -> (i32, i32) {
    %c0_i32 = arith.constant 0 : i32
    return %arg1, %arg2 : i32, i32
  }
  func.func @transform_3(%arg0: i32, %arg1: i32, %arg2: i32) -> (i32, i32) {
    %c0_i32 = arith.constant 0 : i32
    %c0_i32_0 = arith.constant 0 : i32
    %c0_i32_1 = arith.constant 0 : i32
    return %c0_i32, %c0_i32_0 : i32, i32
  }
  func.func @transform_4(%arg0: i32, %arg1: i32, %arg2: i32) -> (i32, i32) {
    %c0_i32 = arith.constant 0 : i32
    %c0_i32_0 = arith.constant 0 : i32
    %c0_i32_1 = arith.constant 0 : i32
    return %c0_i32, %c0_i32_0 : i32, i32
  }
  func.func @transform_5(%arg0: i32, %arg1: i32, %arg2: i32) -> (i32, i32) {
    %c0_i32 = arith.constant 0 : i32
    %c0_i32_0 = arith.constant 0 : i32
    %c0_i32_1 = arith.constant 0 : i32
    return %c0_i32, %c0_i32_0 : i32, i32
  }
  func.func @transform_6(%arg0: i32, %arg1: i32, %arg2: i32) -> (i32, i32) {
    %c1_i32 = arith.constant 1 : i32
    %0 = arith.cmpi eq, %arg0, %c1_i32 : i32
    %c0_i32 = arith.constant 0 : i32
    %1 = arith.select %0, %arg1, %c0_i32 : i32
    %c0_i32_0 = arith.constant 0 : i32
    %c0_i32_1 = arith.constant 0 : i32
    return %1, %c0_i32_0 : i32, i32
  }
}

</mosaic_0001>

<bundles_post_ra>
// kernel: tpu_custom_call.1
= control target key start
LH: loop header
LB: loop body
LE: loop exit
PB: predicated region body
PF: predicated region fallthrough
CT: control target
= control target key end

     0   :  { %11 = vsyncpa [#allocation9], 0  ;;  %s2806_s0 = inlined_call_operand.vmem [shape: f32[3], index: 0, kind: input, shape index: {}]   ;;  %s2807_s1 = inlined_call_operand.hbm [shape: s8[128,128], index: 1, kind: input, shape index: {}]   ;;  %s2808_s2 = inlined_call_operand.vmem [shape: f32[128,128], index: 2, kind: input, shape index: {}]   ;;  %s2809_s3 = inlined_call_operand.vmem [shape: f32[128,1], index: 3, kind: input, shape index: {}]   ;;  %s2810_s4 = inlined_call_operand.vmem [shape: f32[128,1], index: 4, kind: input, shape index: {}]   ;;  %s2811_s5 = inlined_call_operand.vmem [shape: f32[128,128], index: 5, kind: input, shape index: {}]   ;;  %s2812_s6 = inlined_call_operand.hbm [shape: f32[128,128], index: 6, kind: output, shape index: {}]  }
   0x1   :  { %12 = vsyncpa [#allocation7], 0 }
   0x2   :  { %13 = vsyncpa [#allocation8], 0 }
   0x3   :  { %15 = vsyncpa [#allocation8 + $0x1], 0  ;;  %s2131_s21 = smov 0   ;;  %s2133_s22 = smov 0  }
   0x4   :  { %s2135_s23 = smov 0  }
   0x5 LB: > { %s1633_s24 = sadd.s32 4294967295, %s2085_s23   ;;  %s1634_s25 = sadd.s32 4294967294, %s2085_s23   ;;  %s2085_s23 = sphi %s2135_s23, %s21_s23   ;;  %s2081_s22 = sphi %s2133_s22, %s2818_s22   ;;  %s2077_s21 = sphi %s2131_s21, %s2817_s21  }
   0x6   : > { %s40_s26 = sadd.s32 1, %s2081_s22  ;;  %p1635_p0 = scmp.ge.s32.totalorder %s2085_s23, 1 }
   0x7   : > { %p42_p1 = scmp.ge.s32.totalorder %s40_s26, 2  ;;  %p187_p2 = scmp.lt.s32.totalorder %s2085_s23, 3 }
   0x8   : > { %p2153_p3 = scmp.eq.s32.totalorder %s1633_s24, 0  ;;  %s200_s7 = sshll.u32 %s2806_s0, 4  ;;  %s201_s7 = int_to_ptr.vmem [resolvable:$true] %s200_s7 }
   0x9   : > { %s2820_s26 = smov (%p42_p1, %s40_s26), 0  ;;  %p2159_p4 = pnand %p1635_p0, %p187_p2 }
   0xa   : > { %s2087_s8 = smov [#allocation10]   ;;  %s1980_s11 = scalar_lea.vmem %s201_s7, 16 }
   0xb   : > { %p1925_p5 = pneg %p2159_p4  ;;  %s214_s9 = sshll.u32 %s2087_s8, 4  ;;  %s2174_s9 = int_to_ptr.vmem [resolvable:$true] %s214_s9 }
   0xc   : > { %p1981_p7 = scmp.ne.s32.totalorder %s201_s7, %s1980_s11  ;;  %p1988_p11 = scmp.lt.s32.totalorder %s201_s7, %s201_s7 }
   0xd   : > { %p2170_p6 = pnand %p2153_p3, %p1925_p5  ;;  %p1989_p12 = scmp.lt.s32.totalorder %s1980_s11, %s1980_s11 }
   0xf   : > { %p1982_p8 = pneg %p2170_p6  ;;  %p1990_p13 = por %p1989_p12, %p1988_p11 }
  0x11   : > { %p1983_p9 = pnand %p1982_p8, %p1981_p7 }
  0x13   : > { %p1984_p10 = pneg %p1983_p9 }
  0x15   : > { %p1991_p0 = pnand %p1990_p13, %p1984_p10 }
  0x17   : > { %1994 = shalt.err (!%p1991_p0)
}
  0x18   : > { %s2088_s12 = smov [#allocation6]   ;;  %s1995_s15 = scalar_lea.hbm %s2807_s1, 512 }
  0x19   : > { %1928 = dma.vmem_to_smem (!%p2170_p6), %s201_s7, 16, %s2088_s12, [#allocation9]  }
  0x1a   : > { %p1996_p1 = scmp.ne.s32.totalorder %s2807_s1, %s1995_s15  ;;  %p2002_p7 = scmp.lt.u32.totalorder %s1995_s15, %s2807_s1 }
  0x1c   : > { %p1998_p2 = pnand %p1996_p1, %p1982_p8 }
  0x1e   : > { %p1999_p5 = pneg %p1998_p2 }
  0x20   : > { %p2004_p9 = pnand %p2002_p7, %p1999_p5 }
  0x22   : > { %2007 = shalt.err (!%p2004_p9)
}
  0x23   : > { %s2008_s20 = scalar_lea.vmem %s2174_s9, 512  ;;  %p2016_p13 = scmp.lt.s32.totalorder %s2174_s9, %s2174_s9 }
  0x24   : > { %p2009_p10 = scmp.ne.s32.totalorder %s2174_s9, %s2008_s20  ;;  %p2017_p0 = scmp.lt.s32.totalorder %s2008_s20, %s2008_s20 }
  0x26   : > { %p2011_p11 = pnand %p2009_p10, %p1982_p8  ;;  %p2018_p1 = por %p2017_p0, %p2016_p13 }
  0x28   : > { %p2012_p12 = pneg %p2011_p11 }
  0x2a   : > { %p2019_p2 = pnand %p2018_p1, %p2012_p12 }
  0x2c   : > { %2022 = shalt.err (!%p2019_p2)
}
  0x2d   : > { %s2089_s29 = smov 128   ;;  %s2090_s30 = smov 8  }
  0x2e   : > { %1931 = dma.hbm_to_vmem [thread:$0]  (!%p2170_p6), %s2807_s1, 512, %s2174_s9, [#allocation7], %s2089_s29, %s2089_s29, %s2090_s30  }
  0x2f   : > { %239 = sbr.rel (%p2159_p4) target bundleno = 789 (0x315), region = 40 }
  0x36   : > { %2062 = dma.done.wait (%p2153_p3), [#allocation9], 16  }
  0x37   : > { %2064 = vsyncadd (%p2153_p3), [#allocation9], 4294967280 }
  0x38   : > { %2066 = dma.done.wait (%p2153_p3), [#allocation7], 512  }
  0x39   : > { %2068 = vsyncadd (%p2153_p3), [#allocation7], 4294966784 }
  0x3a   : > { %249 = sfence }
  0x3b   : > { %p273_p8 = scmp.eq.s32.totalorder %s2077_s21, 0 }
  0x3d   : > { %281 = sbr.rel (!%p273_p8) target bundleno = 105 (0x69), region = 52 }
  0x44   : > { %v314_v0 = vld [vmem:[%s2808_s2] sm:$0xff]  ;;  %v316_v1 = vld [vmem:[%s2808_s2 + $0x8] sm:$0xff]  ;;  %v318_v2 = vld [vmem:[%s2808_s2 + $0x10] sm:$0xff] }
  0x45   : > { %315 = vst [vmem:[#allocation4] sm:$0xff] %v314_v0  ;;  %317 = vst [vmem:[#allocation4 + $0x8] sm:$0xff] %v316_v1  ;;  %v320_v3 = vld [vmem:[%s2808_s2 + $0x18] sm:$0xff]  ;;  %v322_v4 = vld [vmem:[%s2808_s2 + $0x20] sm:$0xff] }
  0x46   : > { %319 = vst [vmem:[#allocation4 + $0x10] sm:$0xff] %v318_v2  ;;  %v324_v5 = vld [vmem:[%s2808_s2 + $0x28] sm:$0xff]  ;;  %321 = vst [vmem:[#allocation4 + $0x18] sm:$0xff] %v320_v3  ;;  %v326_v6 = vld [vmem:[%s2808_s2 + $0x30] sm:$0xff] }
  0x47   : > { %323 = vst [vmem:[#allocation4 + $0x20] sm:$0xff] %v322_v4  ;;  %325 = vst [vmem:[#allocation4 + $0x28] sm:$0xff] %v324_v5  ;;  %v328_v7 = vld [vmem:[%s2808_s2 + $0x38] sm:$0xff]  ;;  %v330_v8 = vld [vmem:[%s2808_s2 + $0x40] sm:$0xff] }
  0x48   : > { %327 = vst [vmem:[#allocation4 + $0x30] sm:$0xff] %v326_v6  ;;  %329 = vst [vmem:[#allocation4 + $0x38] sm:$0xff] %v328_v7  ;;  %v332_v9 = vld [vmem:[%s2808_s2 + $0x48] sm:$0xff]  ;;  %v334_v10 = vld [vmem:[%s2808_s2 + $0x50] sm:$0xff] }
  0x49   : > { %331 = vst [vmem:[#allocation4 + $0x40] sm:$0xff] %v330_v8  ;;  %v336_v11 = vld [vmem:[%s2808_s2 + $0x58] sm:$0xff]  ;;  %333 = vst [vmem:[#allocation4 + $0x48] sm:$0xff] %v332_v9  ;;  %v338_v12 = vld [vmem:[%s2808_s2 + $0x60] sm:$0xff] }
  0x4a   : > { %335 = vst [vmem:[#allocation4 + $0x50] sm:$0xff] %v334_v10  ;;  %337 = vst [vmem:[#allocation4 + $0x58] sm:$0xff] %v336_v11  ;;  %v340_v13 = vld [vmem:[%s2808_s2 + $0x68] sm:$0xff]  ;;  %v342_v14 = vld [vmem:[%s2808_s2 + $0x70] sm:$0xff] }
  0x4b   : > { %339 = vst [vmem:[#allocation4 + $0x60] sm:$0xff] %v338_v12  ;;  %341 = vst [vmem:[#allocation4 + $0x68] sm:$0xff] %v340_v13  ;;  %v344_v15 = vld [vmem:[%s2808_s2 + $0x78] sm:$0xff] }
  0x4c   : > { %343 = vst [vmem:[#allocation4 + $0x70] sm:$0xff] %v342_v14  ;;  %345 = vst [vmem:[#allocation4 + $0x78] sm:$0xff] %v344_v15 }
  0x4d   : > { %353 = vsyncadd [#allocation12], 2048 }
  0x4e   : > { %2069 = dma.done.wait [#allocation12], 2048 }
  0x4f   : > { %2070 = vsyncadd [#allocation12], 4294965248  ;;  %v2267_v16 = vld [vmem:[#allocation4] sm:$0xff]  ;;  %v2269_v17 = vld [vmem:[#allocation4 + $0x8] sm:$0xff]  ;;  %s2315_s29 = sld [smem:[#allocation6]] }
  0x50   : > { %v2271_v18 = vld [vmem:[#allocation4 + $0x10] sm:$0xff]  ;;  %v373_v19 = vpack.c.bf16 %v2269_v17, %v2267_v16  ;;  %v2275_v20 = vld [vmem:[#allocation4 + $0x18] sm:$0xff]  ;;  %v2277_v21 = vld [vmem:[#allocation4 + $0x20] sm:$0xff] }
  0x51   : > { %v2279_v22 = vld [vmem:[#allocation4 + $0x28] sm:$0xff]  ;;  %v374_v23 = vpack.c.bf16 %v2275_v20, %v2271_v18  ;;  %v2285_v25 = vld [vmem:[#allocation4 + $0x30] sm:$0xff]  ;;  %v2287_v26 = vld [vmem:[#allocation4 + $0x38] sm:$0xff] }
  0x52   : > { %v375_v24 = vpack.c.bf16 %v2279_v22, %v2277_v21  ;;  %v2289_v27 = vld [vmem:[#allocation4 + $0x40] sm:$0xff]  ;;  %381 = vst [vmem:[#allocation2] sm:$0xff] %v373_v19  ;;  %v376_v28 = vpack.c.bf16 %v2287_v26, %v2285_v25  ;;  %v2293_v29 = vld [vmem:[#allocation4 + $0x48] sm:$0xff]  ;;  %v2295_v30 = vld [vmem:[#allocation4 + $0x50] sm:$0xff]  ;;  %v389_v32 = vunpack.c.l.bf16 %v373_v19  ;;  %v390_v33 = vunpack.c.h.bf16 %v373_v19 }
  0x53   : > { %v2297_v31 = vld [vmem:[#allocation4 + $0x58] sm:$0xff]  ;;  %382 = vst [vmem:[#allocation2 + $0x8] sm:$0xff] %v374_v23  ;;  %v377_v34 = vpack.c.bf16 %v2293_v29, %v2289_v27  ;;  %v2303_v36 = vld [vmem:[#allocation4 + $0x60] sm:$0xff]  ;;  %v2305_v37 = vld [vmem:[#allocation4 + $0x68] sm:$0xff]  ;;  %v391_v39 = vunpack.c.l.bf16 %v374_v23  ;;  %v392_v40 = vunpack.c.h.bf16 %v374_v23 }
  0x54   : > { %383 = vst [vmem:[#allocation2 + $0x10] sm:$0xff] %v375_v24  ;;  %v378_v35 = vpack.c.bf16 %v2297_v31, %v2295_v30  ;;  %v2307_v38 = vld [vmem:[#allocation4 + $0x70] sm:$0xff]  ;;  %384 = vst [vmem:[#allocation2 + $0x18] sm:$0xff] %v376_v28  ;;  %v379_v41 = vpack.c.bf16 %v2305_v37, %v2303_v36  ;;  %v2311_v42 = vld [vmem:[#allocation4 + $0x78] sm:$0xff]  ;;  %v405_v43 = vsub.f32 %v2267_v16, %v389_v32  ;;  %v393_v45 = vunpack.c.l.bf16 %v375_v24 }
  0x55   : > { %v406_v44 = vsub.f32 %v2269_v17, %v390_v33  ;;  %385 = vst [vmem:[#allocation2 + $0x20] sm:$0xff] %v377_v34  ;;  %v380_v46 = vpack.c.bf16 %v2311_v42, %v2307_v38  ;;  %v407_v47 = vsub.f32 %v2271_v18, %v391_v39  ;;  %v408_v48 = vsub.f32 %v2275_v20, %v392_v40 }
  0x56   : > { %386 = vst [vmem:[#allocation2 + $0x28] sm:$0xff] %v378_v35  ;;  %v394_v49 = vunpack.c.h.bf16 %v375_v24  ;;  %387 = vst [vmem:[#allocation2 + $0x30] sm:$0xff] %v379_v41  ;;  %v409_v51 = vsub.f32 %v2277_v21, %v393_v45  ;;  %v395_v52 = vunpack.c.l.bf16 %v376_v28  ;;  %v396_v53 = vunpack.c.h.bf16 %v376_v28 }
  0x57   : > { %v421_v50 = vpack.c.bf16 %v406_v44, %v405_v43  ;;  %388 = vst [vmem:[#allocation2 + $0x38] sm:$0xff] %v380_v46  ;;  %v422_v54 = vpack.c.bf16 %v408_v48, %v407_v47  ;;  %v397_v56 = vunpack.c.l.bf16 %v377_v34  ;;  %v398_v57 = vunpack.c.h.bf16 %v377_v34 }
  0x58   : > { %v410_v55 = vsub.f32 %v2279_v22, %v394_v49  ;;  %v411_v58 = vsub.f32 %v2285_v25, %v395_v52  ;;  %v412_v59 = vsub.f32 %v2287_v26, %v396_v53  ;;  %v399_v60 = vunpack.c.l.bf16 %v378_v35 }
  0x59   : > { %429 = vst [vmem:[#allocation3] sm:$0xff] %v421_v50  ;;  %v400_v61 = vunpack.c.h.bf16 %v378_v35  ;;  %430 = vst [vmem:[#allocation3 + $0x8] sm:$0xff] %v422_v54  ;;  %v413_v63 = vsub.f32 %v2289_v27, %v397_v56  ;;  %v414_v0 = vsub.f32 %v2293_v29, %v398_v57  ;;  %v401_v1 = vunpack.c.l.bf16 %v379_v41 }
  0x5a   : > { %v423_v62 = vpack.c.bf16 %v410_v55, %v409_v51  ;;  %v424_v2 = vpack.c.bf16 %v412_v59, %v411_v58  ;;  %v415_v3 = vsub.f32 %v2295_v30, %v399_v60  ;;  %v402_v5 = vunpack.c.h.bf16 %v379_v41 }
  0x5b   : > { %v416_v4 = vsub.f32 %v2297_v31, %v400_v61  ;;  %v425_v6 = vpack.c.bf16 %v414_v0, %v413_v63  ;;  %v417_v7 = vsub.f32 %v2303_v36, %v401_v1  ;;  %v403_v8 = vunpack.c.l.bf16 %v380_v46 }
  0x5c   : > { %431 = vst [vmem:[#allocation3 + $0x10] sm:$0xff] %v423_v62  ;;  %v404_v9 = vunpack.c.h.bf16 %v380_v46  ;;  %432 = vst [vmem:[#allocation3 + $0x18] sm:$0xff] %v424_v2  ;;  %v418_v11 = vsub.f32 %v2305_v37, %v402_v5  ;;  %v438_v12 = vstv %s2315_s29 }
  0x5d   : > { %v426_v10 = vpack.c.bf16 %v416_v4, %v415_v3  ;;  %433 = vst [vmem:[#allocation3 + $0x20] sm:$0xff] %v425_v6  ;;  %v419_v13 = vsub.f32 %v2307_v38, %v403_v8  ;;  %v439_v15 = vmul.f32 %v438_v12, %v2267_v16  ;;  %v440_v19 = vmul.f32 %v438_v12, %v2269_v17 }
  0x5e   : > { %v420_v14 = vsub.f32 %v2311_v42, %v404_v9  ;;  %v427_v23 = vpack.c.bf16 %v418_v11, %v417_v7  ;;  %v441_v24 = vmul.f32 %v438_v12, %v2271_v18  ;;  %v442_v28 = vmul.f32 %v438_v12, %v2275_v20 }
  0x5f   : > { %434 = vst [vmem:[#allocation3 + $0x28] sm:$0xff] %v426_v10  ;;  %v443_v32 = vmul.f32 %v438_v12, %v2277_v21  ;;  %455 = vst [vmem:[#allocation4] sm:$0xff] %v439_v15  ;;  %v444_v34 = vmul.f32 %v438_v12, %v2279_v22  ;;  %v445_v35 = vmul.f32 %v438_v12, %v2285_v25 }
  0x60   : > { %v428_v33 = vpack.c.bf16 %v420_v14, %v419_v13  ;;  %456 = vst [vmem:[#allocation4 + $0x8] sm:$0xff] %v440_v19  ;;  %v446_v39 = vmul.f32 %v438_v12, %v2287_v26  ;;  %435 = vst [vmem:[#allocation3 + $0x30] sm:$0xff] %v427_v23  ;;  %v447_v16 = vmul.f32 %v438_v12, %v2289_v27 }
  0x61   : > { %457 = vst [vmem:[#allocation4 + $0x10] sm:$0xff] %v441_v24  ;;  %458 = vst [vmem:[#allocation4 + $0x18] sm:$0xff] %v442_v28  ;;  %v448_v17 = vmul.f32 %v438_v12, %v2293_v29  ;;  %v449_v18 = vmul.f32 %v438_v12, %v2295_v30  ;;  %v450_v20 = vmul.f32 %v438_v12, %v2297_v31 }
  0x62   : > { %459 = vst [vmem:[#allocation4 + $0x20] sm:$0xff] %v443_v32  ;;  %436 = vst [vmem:[#allocation3 + $0x38] sm:$0xff] %v428_v33  ;;  %v451_v21 = vmul.f32 %v438_v12, %v2303_v36  ;;  %v452_v22 = vmul.f32 %v438_v12, %v2305_v37  ;;  %v453_v25 = vmul.f32 %v438_v12, %v2307_v38 }
  0x63   : > { %460 = vst [vmem:[#allocation4 + $0x28] sm:$0xff] %v444_v34  ;;  %461 = vst [vmem:[#allocation4 + $0x30] sm:$0xff] %v445_v35  ;;  %v454_v26 = vmul.f32 %v438_v12, %v2311_v42 }
  0x64   : > { %462 = vst [vmem:[#allocation4 + $0x38] sm:$0xff] %v446_v39  ;;  %463 = vst [vmem:[#allocation4 + $0x40] sm:$0xff] %v447_v16 }
  0x65   : > { %464 = vst [vmem:[#allocation4 + $0x48] sm:$0xff] %v448_v17  ;;  %465 = vst [vmem:[#allocation4 + $0x50] sm:$0xff] %v449_v18 }
  0x66   : > { %466 = vst [vmem:[#allocation4 + $0x58] sm:$0xff] %v450_v20  ;;  %467 = vst [vmem:[#allocation4 + $0x60] sm:$0xff] %v451_v21 }
  0x67   : > { %468 = vst [vmem:[#allocation4 + $0x68] sm:$0xff] %v452_v22  ;;  %469 = vst [vmem:[#allocation4 + $0x70] sm:$0xff] %v453_v25 }
  0x68   : > { %470 = vst [vmem:[#allocation4 + $0x78] sm:$0xff] %v454_v26 }
  0x69 PF: > { %s471_s30 = sand.u32 1, %s2077_s21  ;;  %v2351_v27 = vld [vmem:[#allocation10] sm:$0xff]  ;;  %v2091_v30 = vmov 0   ;;  %v865_v31 = vld [vmem:[%s2809_s3 + $0x10] sm:$0xff]  ;;  %v866_v42 = vld [vmem:[%s2809_s3 + $0x18] sm:$0xff]  ;;  %p1128_p3 = scmp.eq.s32.totalorder %s2077_s21, 1 }
  0x6a   : > { %s1658_s7 = sshll.u32 %s471_s30, 6  ;;  %v498_v29 = vunpack.c.l.s8.bf16 %v2351_v27  ;;  %1977 = vset.pattern.permute.xlu1 %v2091_v30  ;;  %1976 = vset.pattern.permute.xlu0 %v2091_v30  ;;  %v863_v36 = vld [vmem:[%s2809_s3] sm:$0xff]  ;;  %v864_v43 = vld [vmem:[%s2809_s3 + $0x8] sm:$0xff]  ;;  %v870_v50 = vld [vmem:[%s2809_s3 + $0x38] sm:$0xff]  ;;  %v499_v5 = vunpack.c.h.s8.bf16 %v2351_v27 }
  0x6b   : > { %891 = vperm.xlu1 %1977, %v865_v31   ;;  %881 = vperm.xlu0 %1976, %v863_v36   ;;  %s2360_s11 = scalar_lea.vmem [#allocation3], %s1658_s7  ;;  %s2365_s12 = scalar_lea.vmem [#allocation2], %s1658_s7  ;;  %v868_v46 = vld [vmem:[%s2809_s3 + $0x28] sm:$0xff]  ;;  %v867_v47 = vld [vmem:[%s2809_s3 + $0x20] sm:$0xff]  ;;  %v869_v51 = vld [vmem:[%s2809_s3 + $0x30] sm:$0xff] }
  0x6c   : > { %v2363_v37 = vld [vmem:[%s2360_s11] sm:$0xff]  ;;  %v2371_v40 = vld [vmem:[%s2360_s11 + $0x8] sm:$0xff]  ;;  %1745 = vmatprep.mubr.bf16.mxu1 %v498_v29  ;;  %1777 = vmatprep.mubr.bf16.mxu0 %v498_v29  ;;  %v2389_v44 = vld [vmem:[%s2360_s11 + $0x10] sm:$0xff] }
  0x6d   : > { %v2368_v38 = vld [vmem:[%s2365_s12] sm:$0xff]  ;;  %1729 = vmatprep.subr.bf16.mxu1 %v2363_v37  ;;  %v2376_v41 = vld [vmem:[%s2365_s12 + $0x8] sm:$0xff]  ;;  %v2392_v45 = vld [vmem:[%s2365_s12 + $0x10] sm:$0xff]  ;;  %v816_v32 = vunpack.c.l.bf16 %v2371_v40  ;;  %v814_v34 = vunpack.c.l.bf16 %v2363_v37  ;;  %v817_v39 = vunpack.c.h.bf16 %v2371_v40  ;;  %v815_v25 = vunpack.c.h.bf16 %v2363_v37 }
  0x6e   : > { %1761 = vmatprep.subr.bf16.mxu0 %v2368_v38  ;;  %1730 = vmatpush3.bf16.msra.mxu1 %v2363_v37  ;;  %v2405_v48 = vld [vmem:[%s2360_s11 + $0x18] sm:$0xff]  ;;  %v2421_v52 = vld [vmem:[%s2360_s11 + $0x20] sm:$0xff]  ;;  %v872_v54 = vld [vmem:[%s2809_s3 + $0x48] sm:$0xff]  ;;  %v790_v28 = vunpack.c.l.bf16 %v2376_v41  ;;  %v788_v33 = vunpack.c.l.bf16 %v2368_v38  ;;  %v791_v35 = vunpack.c.h.bf16 %v2376_v41  ;;  %v789_v22 = vunpack.c.h.bf16 %v2368_v38 }
  0x6f   : > { %1762 = vmatpush3.bf16.msra.mxu0 %v2368_v38  ;;  %1731 = vmatprep.subr.bf16.mxu1 %v2371_v40  ;;  %v2408_v49 = vld [vmem:[%s2365_s12 + $0x18] sm:$0xff]  ;;  %v2424_v53 = vld [vmem:[%s2365_s12 + $0x20] sm:$0xff]  ;;  %v2437_v56 = vld [vmem:[%s2360_s11 + $0x28] sm:$0xff]  ;;  %v820_v27 = vunpack.c.l.bf16 %v2405_v48  ;;  %v792_v29 = vunpack.c.l.bf16 %v2392_v45  ;;  %v818_v30 = vunpack.c.l.bf16 %v2389_v44  ;;  %v821_v36 = vunpack.c.h.bf16 %v2405_v48 }
  0x70   : > { %1763 = vmatprep.subr.bf16.mxu0 %v2376_v41  ;;  %896 = vperm.xlu1 %1977, %v866_v42   ;;  %v871_v55 = vld [vmem:[%s2809_s3 + $0x40] sm:$0xff]  ;;  %v2440_v57 = vld [vmem:[%s2365_s12 + $0x28] sm:$0xff]  ;;  %v874_v58 = vld [vmem:[%s2809_s3 + $0x58] sm:$0xff]  ;;  %v832_v18 = vadd.f32 %v816_v32, %v790_v28  ;;  %v830_v20 = vadd.f32 %v814_v34, %v788_v33  ;;  %v833_v21 = vadd.f32 %v817_v39, %v791_v35  ;;  %v794_v26 = vunpack.c.l.bf16 %v2408_v49 }
  0x71   : > { %886 = vperm.xlu0 %1976, %v864_v43   ;;  %v873_v59 = vld [vmem:[%s2809_s3 + $0x50] sm:$0xff]  ;;  %v876_v62 = vld [vmem:[%s2809_s3 + $0x68] sm:$0xff]  ;;  %v875_v63 = vld [vmem:[%s2809_s3 + $0x60] sm:$0xff]  ;;  %v795_v31 = vunpack.c.h.bf16 %v2408_v49  ;;  %v798_v37 = vunpack.c.l.bf16 %v2440_v57  ;;  %v824_v43 = vunpack.c.l.bf16 %v2437_v56 }
  0x72   : > { %1732 = vmatpush3.bf16.msra.mxu1 %v2371_v40  ;;  %v2453_v60 = vld [vmem:[%s2360_s11 + $0x30] sm:$0xff]  ;;  %v2469_v0 = vld [vmem:[%s2360_s11 + $0x38] sm:$0xff]  ;;  %v495_v4 = vld [vmem:[#allocation10 + $0x8] sm:$0xff]  ;;  %s472_s11 = sadd.s32 1, %s2077_s21  ;;  %v793_v40 = vunpack.c.h.bf16 %v2392_v45 }
  0x73   : > { %1764 = vmatpush3.bf16.msra.mxu0 %v2376_v41  ;;  %1733 = vmatprep.subr.bf16.mxu1 %v2389_v44  ;;  %v2456_v61 = vld [vmem:[%s2365_s12 + $0x30] sm:$0xff]  ;;  %v2472_v1 = vld [vmem:[%s2365_s12 + $0x38] sm:$0xff]  ;;  %v500_v6 = vunpack.c.l.s8.bf16 %v495_v4  ;;  %v501_v8 = vunpack.c.h.s8.bf16 %v495_v4  ;;  %s1008_s12 = sld [smem:[#allocation6 + %s472_s11]]  ;;  %v819_v41 = vunpack.c.h.bf16 %v2389_v44  ;;  %s2533_s8 = sand.u32 1, %s472_s11 }
  0x74   : > { %1765 = vmatprep.subr.bf16.mxu0 %v2392_v45  ;;  %906 = vperm.xlu1 %1977, %v868_v46   ;;  %v878_v2 = vld [vmem:[%s2809_s3 + $0x78] sm:$0xff]  ;;  %v877_v3 = vld [vmem:[%s2809_s3 + $0x70] sm:$0xff]  ;;  %v796_v46 = vunpack.c.l.bf16 %v2424_v53  ;;  %s1662_s9 = sshll.u32 %s2533_s8, 6  ;;  %v802_v33 = vunpack.c.l.bf16 %v2472_v1 }
  0x75   : > { %901 = vperm.xlu0 %1976, %v867_v47   ;;  %v496_v7 = vld [vmem:[#allocation10 + $0x10] sm:$0xff]  ;;  %v497_v10 = vld [vmem:[#allocation10 + $0x18] sm:$0xff]  ;;  %v822_v47 = vunpack.c.l.bf16 %v2421_v52  ;;  %s2569_s10 = scalar_lea.vmem [#allocation2], %s1662_s9  ;;  %s2603_s28 = scalar_lea.vmem [#allocation3], %s1662_s9 }
  0x76   : > { %1734 = vmatpush3.bf16.msra.mxu1 %v2389_v44  ;;  %v502_v9 = vunpack.c.l.s8.bf16 %v496_v7  ;;  %v503_v11 = vunpack.c.h.s8.bf16 %v496_v7  ;;  %v504_v12 = vunpack.c.l.s8.bf16 %v497_v10  ;;  %v505_v13 = vunpack.c.h.s8.bf16 %v497_v10  ;;  %v994_v34 = vld [vmem:[#allocation4 + $0x10] sm:$0xff] }
  0x77   : > { %1766 = vmatpush3.bf16.msra.mxu0 %v2392_v45  ;;  %1735 = vmatprep.subr.bf16.mxu1 %v2405_v48  ;;  %v825_v45 = vunpack.c.h.bf16 %v2437_v56  ;;  %v797_v44 = vunpack.c.h.bf16 %v2424_v53 }
  0x78   : > { %1767 = vmatprep.subr.bf16.mxu0 %v2408_v49  ;;  %916 = vperm.xlu1 %1977, %v870_v50  }
  0x79   : > { %911 = vperm.xlu0 %1976, %v869_v51   ;;  %v823_v51 = vunpack.c.h.bf16 %v2421_v52 }
  0x7a   : > { %1736 = vmatpush3.bf16.msra.mxu1 %v2405_v48  ;;  %v799_v48 = vunpack.c.h.bf16 %v2440_v57 }
  0x7b   : > { %1768 = vmatpush3.bf16.msra.mxu0 %v2408_v49  ;;  %1737 = vmatprep.subr.bf16.mxu1 %v2421_v52 }
  0x7c   : > { %1769 = vmatprep.subr.bf16.mxu0 %v2424_v53  ;;  %926 = vperm.xlu1 %1977, %v872_v54  }
  0x7d   : > { %921 = vperm.xlu0 %1976, %v871_v55   ;;  %v2527_v55 = vstv %s1008_s12 }
  0x7e   : > { %1738 = vmatpush3.bf16.msra.mxu1 %v2421_v52  ;;  %v2539_v52 = vadd.f32 %v819_v41, %v793_v40  ;;  %v801_v41 = vunpack.c.h.bf16 %v2456_v61 }
  0x7f   : > { %1770 = vmatpush3.bf16.msra.mxu0 %v2424_v53  ;;  %1739 = vmatprep.subr.bf16.mxu1 %v2437_v56  ;;  %v2537_v53 = vadd.f32 %v821_v36, %v795_v31  ;;  %v995_v31 = vld [vmem:[#allocation4 + $0x18] sm:$0xff] }
  0x80   : > { %1771 = vmatprep.subr.bf16.mxu0 %v2440_v57  ;;  %936 = vperm.xlu1 %1977, %v874_v58  }
  0x81   : > { %931 = vperm.xlu0 %1976, %v873_v59  }
  0x82   : > { %1740 = vmatpush3.bf16.msra.mxu1 %v2437_v56  ;;  %v2535_v56 = vadd.f32 %v818_v30, %v792_v29  ;;  %v803_v29 = vunpack.c.h.bf16 %v2472_v1  ;;  %v829_v30 = vunpack.c.h.bf16 %v2469_v0 }
  0x83   : > { %1772 = vmatpush3.bf16.msra.mxu0 %v2440_v57  ;;  %1741 = vmatprep.subr.bf16.mxu1 %v2453_v60 }
  0x84   : > { %1773 = vmatprep.subr.bf16.mxu0 %v2456_v61  ;;  %946 = vperm.xlu1 %1977, %v876_v62   ;;  %v831_v62 = vadd.f32 %v815_v25, %v789_v22  ;;  %v800_v22 = vunpack.c.l.bf16 %v2456_v61 }
  0x85   : > { %941 = vperm.xlu0 %1976, %v875_v63   ;;  %v2529_v63 = vadd.f32 %v820_v27, %v794_v26 }
  0x86   : > { %1742 = vmatpush3.bf16.msra.mxu1 %v2453_v60 }
  0x87   : > { %1774 = vmatpush3.bf16.msra.mxu0 %v2456_v61  ;;  %1743 = vmatprep.subr.bf16.mxu1 %v2469_v0 }
  0x88   : > { %1775 = vmatprep.subr.bf16.mxu0 %v2472_v1  ;;  %956 = vperm.xlu1 %1977, %v878_v2  }
  0x89   : > { %951 = vperm.xlu0 %1976, %v877_v3  }
  0x8a   : > { %1744 = vmatpush3.bf16.msra.mxu1 %v2469_v0 }
  0x8b   : > { %1776 = vmatpush3.bf16.msra.mxu0 %v2472_v1 }
  0x8d   : > { %1746 = vmatmul.mubr.bf16.vlgmr.msra.gmra.mrb[0].mxu1 %v499_v5 }
  0x8e   : > { %1778 = vmatmul.mubr.bf16.vlgmr.msra.gmra.mrb[0].mxu0 %v499_v5  ;;  %1749 = vmatprep.mubr.bf16.mxu1 %v500_v6 }
  0x8f   : > { %1781 = vmatprep.mubr.bf16.mxu0 %v500_v6 }
  0x95   : > { %1750 = vmatmul.mubr.bf16.gmra.mrb[4].mxu1 %v501_v8 }
  0x96   : > { %1782 = vmatmul.mubr.bf16.gmra.mrb[4].mxu0 %v501_v8  ;;  %1753 = vmatprep.mubr.bf16.mxu1 %v502_v9  ;;  %v2541_v8 = vadd.f32 %v824_v43, %v798_v37  ;;  %v827_v37 = vunpack.c.h.bf16 %v2453_v60 }
  0x97   : > { %1785 = vmatprep.mubr.bf16.mxu0 %v502_v9  ;;  %v2543_v9 = vadd.f32 %v822_v47, %v796_v46 }
  0x9d   : > { %1754 = vmatmul.mubr.bf16.gmra.mrb[8].mxu1 %v503_v11 }
  0x9e   : > { %1786 = vmatmul.mubr.bf16.gmra.mrb[8].mxu0 %v503_v11  ;;  %1757 = vmatprep.mubr.bf16.mxu1 %v504_v12 }
  0x9f   : > { %1789 = vmatprep.mubr.bf16.mxu0 %v504_v12  ;;  %v2545_v12 = vadd.f32 %v825_v45, %v799_v48 }
  0xa5   : > { %1758 = vmatmul.mubr.bf16.gmra.mrb[12].mxu1 %v505_v13 }
  0xa6   : > { %1790 = vmatmul.mubr.bf16.gmra.mrb[12].mxu0 %v505_v13  ;;  %v2547_v13 = vadd.f32 %v823_v51, %v797_v44 }
  0xea   : > { %v882_v14 = vpop.permute.xlu0 %881  ;;  %v892_v15 = vpop.permute.xlu1 %891 }
  0xef   : > { %v897_v23 = vpop.permute.xlu1 %896 }
  0xf0   : > { %v2488_v19 = vpop.permute.xlu0 %886 }
  0xf3   : > { %v2499_v16 = vpop.permute.xlu1 %906 }
  0xf4   : > { %v2490_v24 = vpop.permute.xlu0 %901 }
  0xf7   : > { %v2515_v42 = vpop.permute.xlu1 %916 }
  0xf8   : > { %v2501_v17 = vpop.permute.xlu0 %911 }
  0xfb   : > { %v2555_v25 = vpop.permute.xlu1 %926 }
  0xfc   : > { %v2517_v38 = vpop.permute.xlu0 %921 }
 0x100   : > { %v2557_v26 = vpop.permute.xlu0 %931 }
 0x160   : > { %v1747_v49 = vpop.f32.mrb[0].mxu1 }
 0x161   : > { %v1779_v50 = vpop.f32.mrb[0].mxu0  ;;  %v564_v58 = vpop.f32.mrb[1].mxu1 }
 0x162   : > { %v670_v54 = vadd.f32 %v1779_v50, %v1747_v49  ;;  %v661_v59 = vpop.f32.mrb[1].mxu0  ;;  %v1748_v3 = vpop.f32.mrb[2].mxu1 }
 0x163   : > { %v662_v2 = vadd.f32 %v661_v59, %v564_v58  ;;  %v1780_v57 = vpop.f32.mrb[2].mxu0  ;;  %v567_v6 = vpop.f32.mrb[3].mxu1 }
 0x164   : > { %v961_v4 = vmul.f32 %v892_v15, %v670_v54  ;;  %v673_v5 = vadd.f32 %v1780_v57, %v1748_v3  ;;  %v664_v7 = vpop.f32.mrb[3].mxu0  ;;  %v828_v15 = vunpack.c.l.bf16 %v2469_v0 }
 0x165   : > { %v959_v10 = vmul.f32 %v882_v14, %v662_v2  ;;  %v665_v11 = vadd.f32 %v664_v7, %v567_v6  ;;  %v826_v14 = vunpack.c.l.bf16 %v2453_v60 }
 0x166   : > { %v977_v28 = vsub.f32 %v832_v18, %v961_v4  ;;  %v962_v32 = vmul.f32 %v897_v23, %v673_v5  ;;  %v992_v23 = vld [vmem:[#allocation4] sm:$0xff] }
 0x167   : > { %v975_v35 = vsub.f32 %v830_v20, %v959_v10  ;;  %v960_v39 = vmul.f32 %v2488_v19, %v665_v11 }
 0x168   : > { %v1012_v18 = vmul.f32 %v2527_v55, %v977_v28  ;;  %v978_v27 = vsub.f32 %v833_v21, %v962_v32  ;;  %v1751_v36 = vpop.f32.mrb[4].mxu1  ;;  %v993_v21 = vld [vmem:[#allocation4 + $0x8] sm:$0xff] }
 0x169   : > { %v1010_v20 = vmul.f32 %v2527_v55, %v975_v35  ;;  %v976_v19 = vsub.f32 %v831_v62, %v960_v39  ;;  %v1783_v40 = vpop.f32.mrb[4].mxu0  ;;  %v580_v50 = vpop.f32.mrb[5].mxu1 }
 0x16a   : > { %v1028_v43 = vadd.f32 %v1012_v18, %v994_v34  ;;  %v1013_v46 = vmul.f32 %v2527_v55, %v978_v27  ;;  %v1059_v47 = vpack.c.bf16 %v978_v27, %v977_v28  ;;  %v686_v49 = vadd.f32 %v1783_v40, %v1751_v36  ;;  %v677_v48 = vpop.f32.mrb[5].mxu0  ;;  %v1752_v58 = vpop.f32.mrb[6].mxu1 }
 0x16b   : > { %v1026_v45 = vadd.f32 %v1010_v20, %v992_v23  ;;  %v1011_v44 = vmul.f32 %v2527_v55, %v976_v19  ;;  %v1058_v51 = vpack.c.bf16 %v976_v19, %v975_v35  ;;  %v678_v54 = vadd.f32 %v677_v48, %v580_v50  ;;  %v1784_v59 = vpop.f32.mrb[6].mxu0  ;;  %v583_v4 = vpop.f32.mrb[7].mxu1 }
 0x16c   : > { %1044 = vst [vmem:[#allocation4 + $0x10] sm:$0xff] %v1028_v43  ;;  %v1029_v62 = vadd.f32 %v1013_v46, %v995_v31  ;;  %1071 = vst [vmem:[%s2569_s10 + $0x8] sm:$0xff] %v1059_v47  ;;  %v1080_v2 = vunpack.c.l.bf16 %v1059_v47  ;;  %v1081_v3 = vunpack.c.h.bf16 %v1059_v47  ;;  %v965_v57 = vmul.f32 %v2501_v17, %v686_v49  ;;  %v680_v5 = vpop.f32.mrb[7].mxu0  ;;  %v998_v17 = vld [vmem:[#allocation4 + $0x30] sm:$0xff]  ;;  %v937_v40 = vpop.permute.xlu1 %936 }
 0x16d   : > { %1042 = vst [vmem:[#allocation4] sm:$0xff] %v1026_v45  ;;  %v1027_v6 = vadd.f32 %v1011_v44, %v993_v21  ;;  %1070 = vst [vmem:[%s2569_s10] sm:$0xff] %v1058_v51  ;;  %v1078_v7 = vunpack.c.l.bf16 %v1058_v51  ;;  %v1079_v10 = vunpack.c.h.bf16 %v1058_v51  ;;  %v963_v11 = vmul.f32 %v2490_v24, %v678_v54  ;;  %v2581_v43 = vpop.permute.xlu0 %941 }
 0x16e   : > { %1045 = vst [vmem:[#allocation4 + $0x18] sm:$0xff] %v1029_v62  ;;  %v1096_v32 = vsub.f32 %v977_v28, %v1080_v2  ;;  %v1097_v34 = vsub.f32 %v978_v27, %v1081_v3  ;;  %v2576_v39 = vsub.f32 %v2529_v63, %v965_v57  ;;  %v689_v18 = vadd.f32 %v1784_v59, %v1752_v58  ;;  %v996_v27 = vld [vmem:[#allocation4 + $0x20] sm:$0xff] }
 0x16f   : > { %1043 = vst [vmem:[#allocation4 + $0x8] sm:$0xff] %v1027_v6  ;;  %v1094_v23 = vsub.f32 %v975_v35, %v1078_v7  ;;  %v1095_v20 = vsub.f32 %v976_v19, %v1079_v10  ;;  %v2579_v31 = vsub.f32 %v2535_v56, %v963_v11  ;;  %v681_v36 = vadd.f32 %v680_v5, %v583_v4  ;;  %v1002_v6 = vld [vmem:[#allocation4 + $0x50] sm:$0xff] }
 0x170   : > { %v1111_v24 = vpack.c.bf16 %v1097_v34, %v1096_v32  ;;  %v1016_v28 = vmul.f32 %v2527_v55, %v2576_v39  ;;  %v966_v63 = vmul.f32 %v2515_v42, %v689_v18  ;;  %v2590_v35 = vadd.f32 %v828_v15, %v802_v33  ;;  %v1755_v47 = vpop.f32.mrb[8].mxu1  ;;  %v2635_v10 = vpop.permute.xlu1 %946 }
 0x171   : > { %v1110_v19 = vpack.c.bf16 %v1095_v20, %v1094_v23  ;;  %v1014_v56 = vmul.f32 %v2527_v55, %v2579_v31  ;;  %v964_v46 = vmul.f32 %v2499_v16, %v681_v36  ;;  %v1787_v21 = vpop.f32.mrb[8].mxu0  ;;  %v2599_v49 = vadd.f32 %v826_v14, %v800_v22  ;;  %v596_v50 = vpop.f32.mrb[9].mxu1  ;;  %v999_v14 = vld [vmem:[#allocation4 + $0x38] sm:$0xff] }
 0x172   : > { %1121 = vst [vmem:[%s2603_s28 + $0x8] sm:$0xff] %v1111_v24  ;;  %v1032_v42 = vadd.f32 %v1016_v28, %v998_v17  ;;  %v982_v33 = vsub.f32 %v2537_v53, %v966_v63  ;;  %v702_v15 = vadd.f32 %v1787_v21, %v1755_v47  ;;  %v693_v16 = vpop.f32.mrb[9].mxu0  ;;  %v2611_v48 = vadd.f32 %v829_v30, %v803_v29  ;;  %v1756_v51 = vpop.f32.mrb[10].mxu1  ;;  %v997_v29 = vld [vmem:[#allocation4 + $0x28] sm:$0xff] }
 0x173   : > { %1120 = vst [vmem:[%s2603_s28] sm:$0xff] %v1110_v19  ;;  %v1030_v22 = vadd.f32 %v1014_v56, %v996_v27  ;;  %v980_v45 = vsub.f32 %v2539_v52, %v964_v46  ;;  %v694_v44 = vadd.f32 %v693_v16, %v596_v50  ;;  %v1788_v54 = vpop.f32.mrb[10].mxu0  ;;  %v2619_v53 = vadd.f32 %v827_v37, %v801_v41  ;;  %v599_v58 = vpop.f32.mrb[11].mxu1 }
 0x174   : > { %1048 = vst [vmem:[#allocation4 + $0x30] sm:$0xff] %v1032_v42  ;;  %v1017_v0 = vmul.f32 %v2527_v55, %v982_v33  ;;  %v1061_v1 = vpack.c.bf16 %v982_v33, %v2576_v39  ;;  %v969_v30 = vmul.f32 %v2557_v26, %v702_v15  ;;  %v705_v52 = vadd.f32 %v1788_v54, %v1756_v51  ;;  %v696_v59 = vpop.f32.mrb[11].mxu0  ;;  %v952_v11 = vpop.permute.xlu0 %951 }
 0x175   : > { %1046 = vst [vmem:[#allocation4 + $0x20] sm:$0xff] %v1030_v22  ;;  %v1015_v61 = vmul.f32 %v2527_v55, %v980_v45  ;;  %v1060_v60 = vpack.c.bf16 %v980_v45, %v2579_v31  ;;  %v967_v41 = vmul.f32 %v2517_v38, %v694_v44  ;;  %v697_v37 = vadd.f32 %v696_v59, %v599_v58 }
 0x176   : > { %v1033_v62 = vadd.f32 %v1017_v0, %v999_v14  ;;  %1073 = vst [vmem:[%s2569_s10 + $0x18] sm:$0xff] %v1061_v1  ;;  %v1084_v2 = vunpack.c.l.bf16 %v1061_v1  ;;  %v1085_v3 = vunpack.c.h.bf16 %v1061_v1  ;;  %v2629_v57 = vsub.f32 %v2541_v8, %v969_v30  ;;  %v1000_v8 = vld [vmem:[#allocation4 + $0x40] sm:$0xff]  ;;  %v957_v30 = vpop.permute.xlu1 %956 }
 0x177   : > { %v1031_v4 = vadd.f32 %v1015_v61, %v997_v29  ;;  %1072 = vst [vmem:[%s2569_s10 + $0x10] sm:$0xff] %v1060_v60  ;;  %v1082_v26 = vunpack.c.l.bf16 %v1060_v60  ;;  %v1083_v5 = vunpack.c.h.bf16 %v1060_v60  ;;  %v2633_v7 = vsub.f32 %v2543_v9, %v967_v41  ;;  %v1006_v61 = vld [vmem:[#allocation4 + $0x70] sm:$0xff] }
 0x178   : > { %1049 = vst [vmem:[#allocation4 + $0x38] sm:$0xff] %v1033_v62  ;;  %v1100_v38 = vsub.f32 %v2576_v39, %v1084_v2  ;;  %v1101_v32 = vsub.f32 %v982_v33, %v1085_v3  ;;  %v1020_v34 = vmul.f32 %v2527_v55, %v2629_v57  ;;  %v970_v18 = vmul.f32 %v937_v40, %v705_v52  ;;  %v1759_v36 = vpop.f32.mrb[12].mxu1  ;;  %v1004_v62 = vld [vmem:[#allocation4 + $0x60] sm:$0xff] }
 0x179   : > { %1047 = vst [vmem:[#allocation4 + $0x28] sm:$0xff] %v1031_v4  ;;  %v1098_v23 = vsub.f32 %v2579_v31, %v1082_v26  ;;  %v1099_v20 = vsub.f32 %v980_v45, %v1083_v5  ;;  %v1018_v9 = vmul.f32 %v2527_v55, %v2633_v7  ;;  %v968_v17 = vmul.f32 %v2555_v25, %v697_v37  ;;  %v1791_v24 = vpop.f32.mrb[12].mxu0  ;;  %v612_v19 = vpop.f32.mrb[13].mxu1  ;;  %v1003_v31 = vld [vmem:[#allocation4 + $0x58] sm:$0xff] }
 0x17a   : > { %v1113_v28 = vpack.c.bf16 %v1101_v32, %v1100_v38  ;;  %v1036_v39 = vadd.f32 %v1020_v34, %v1002_v6  ;;  %v986_v27 = vsub.f32 %v2545_v12, %v970_v18  ;;  %v718_v63 = vadd.f32 %v1791_v24, %v1759_v36  ;;  %v709_v56 = vpop.f32.mrb[13].mxu0  ;;  %v1760_v42 = vpop.f32.mrb[14].mxu1  ;;  %v1001_v12 = vld [vmem:[#allocation4 + $0x48] sm:$0xff]  ;;  %v1007_v38 = vld [vmem:[#allocation4 + $0x78] sm:$0xff] }
 0x17b   : > { %v1112_v40 = vpack.c.bf16 %v1099_v20, %v1098_v23  ;;  %v1034_v46 = vadd.f32 %v1018_v9, %v1000_v8  ;;  %v984_v47 = vsub.f32 %v2547_v13, %v968_v17  ;;  %v710_v21 = vadd.f32 %v709_v56, %v612_v19  ;;  %v1792_v33 = vpop.f32.mrb[14].mxu0  ;;  %v615_v22 = vpop.f32.mrb[15].mxu1  ;;  %v1005_v8 = vld [vmem:[#allocation4 + $0x68] sm:$0xff]  ;;  %v1151_v19 = vld [vmem:[%s2810_s4] sm:$0xff] (%p1128_p3) }
 0x17c   : > { %1123 = vst [vmem:[%s2603_s28 + $0x18] sm:$0xff] %v1113_v28  ;;  %1052 = vst [vmem:[#allocation4 + $0x50] sm:$0xff] %v1036_v39  ;;  %v1021_v25 = vmul.f32 %v2527_v55, %v986_v27  ;;  %v1063_v15 = vpack.c.bf16 %v986_v27, %v2629_v57  ;;  %v973_v50 = vmul.f32 %v952_v11, %v718_v63  ;;  %v712_v14 = vpop.f32.mrb[15].mxu0  ;;  %v2092_v56 = vmov (%p1128_p3), 0  }
 0x17d   : > { %v721_v16 = vadd.f32 %v1792_v33, %v1760_v42  ;;  %1122 = vst [vmem:[%s2603_s28 + $0x10] sm:$0xff] %v1112_v40  ;;  %1050 = vst [vmem:[#allocation4 + $0x40] sm:$0xff] %v1034_v46  ;;  %v1019_v13 = vmul.f32 %v2527_v55, %v984_v47  ;;  %v1062_v45 = vpack.c.bf16 %v984_v47, %v2633_v7  ;;  %1979 = vset.pattern.permute.xlu1 (%p1128_p3), %v2092_v56  ;;  %v1160_v40 = vld [vmem:[%s2810_s4 + $0x48] sm:$0xff] (%p1128_p3)  ;;  %v1159_v46 = vld [vmem:[%s2810_s4 + $0x40] sm:$0xff] (%p1128_p3) }
 0x17e   : > { %v971_v44 = vmul.f32 %v2581_v43, %v710_v21  ;;  %v713_v51 = vadd.f32 %v712_v14, %v615_v22  ;;  %v1037_v54 = vadd.f32 %v1021_v25, %v1003_v31  ;;  %1075 = vst [vmem:[%s2569_s10 + $0x28] sm:$0xff] %v1063_v15  ;;  %v1088_v0 = vunpack.c.l.bf16 %v1063_v15  ;;  %1978 = vset.pattern.permute.xlu0 (%p1128_p3), %v2092_v56  ;;  %v1263_v31 = vld [vmem:[%s2811_s5] sm:$0xff] (%p1128_p3)  ;;  %v1265_v42 = vld [vmem:[%s2811_s5 + $0x10] sm:$0xff] (%p1128_p3)  ;;  %v1266_v33 = vld [vmem:[%s2811_s5 + $0x18] sm:$0xff] (%p1128_p3) }
 0x17f   : > { %v1089_v1 = vunpack.c.h.bf16 %v1063_v15  ;;  %v989_v29 = vsub.f32 %v2590_v35, %v973_v50  ;;  %v1035_v52 = vadd.f32 %v1019_v13, %v1001_v12  ;;  %1074 = vst [vmem:[%s2569_s10 + $0x20] sm:$0xff] %v1062_v45  ;;  %v1086_v58 = vunpack.c.l.bf16 %v1062_v45  ;;  %1169 = vperm.xlu0 (%p1128_p3), %1978, %v1151_v19   ;;  %v1161_v25 = vld [vmem:[%s2810_s4 + $0x50] sm:$0xff] (%p1128_p3)  ;;  %v1267_v50 = vld [vmem:[%s2811_s5 + $0x20] sm:$0xff] (%p1128_p3)  ;;  %v1162_v22 = vld [vmem:[%s2810_s4 + $0x58] sm:$0xff] (%p1128_p3) }
 0x180   : > { %v1087_v59 = vunpack.c.h.bf16 %v1062_v45  ;;  %v987_v60 = vsub.f32 %v2599_v49, %v971_v44  ;;  %1053 = vst [vmem:[#allocation4 + $0x58] sm:$0xff] %v1037_v54  ;;  %v1104_v41 = vsub.f32 %v2629_v57, %v1088_v0  ;;  %v974_v2 = vmul.f32 %v957_v30, %v721_v16  ;;  %v1153_v15 = vld [vmem:[%s2810_s4 + $0x10] sm:$0xff] (%p1128_p3)  ;;  %v1268_v16 = vld [vmem:[%s2811_s5 + $0x28] sm:$0xff] (%p1128_p3)  ;;  %v1154_v14 = vld [vmem:[%s2810_s4 + $0x18] sm:$0xff] (%p1128_p3) }
 0x181   : > { %v1105_v37 = vsub.f32 %v986_v27, %v1089_v1  ;;  %v1024_v43 = vmul.f32 %v2527_v55, %v989_v29  ;;  %1051 = vst [vmem:[#allocation4 + $0x48] sm:$0xff] %v1035_v52  ;;  %v1102_v35 = vsub.f32 %v2633_v7, %v1086_v58  ;;  %v972_v26 = vmul.f32 %v2635_v10, %v713_v51  ;;  %v1269_v45 = vld [vmem:[%s2811_s5 + $0x30] sm:$0xff] (%p1128_p3)  ;;  %v1270_v44 = vld [vmem:[%s2811_s5 + $0x38] sm:$0xff] (%p1128_p3)  ;;  %v1163_v51 = vld [vmem:[%s2810_s4 + $0x60] sm:$0xff] (%p1128_p3) }
 0x182   : > { %v1103_v3 = vsub.f32 %v984_v47, %v1087_v59  ;;  %v1022_v4 = vmul.f32 %v2527_v55, %v987_v60  ;;  %v990_v57 = vsub.f32 %v2611_v48, %v974_v2  ;;  %v1264_v47 = vld [vmem:[%s2811_s5 + $0x8] sm:$0xff] (%p1128_p3)  ;;  %v1853_v12 = vpack.c.bf16 (%p1128_p3), %v1266_v33, %v1265_v42  ;;  %v1155_v54 = vld [vmem:[%s2810_s4 + $0x20] sm:$0xff] (%p1128_p3)  ;;  %v1273_v59 = vld [vmem:[%s2811_s5 + $0x50] sm:$0xff] (%p1128_p3) }
 0x183   : > { %v1115_v5 = vpack.c.bf16 %v1105_v37, %v1104_v41  ;;  %v1040_v49 = vadd.f32 %v1024_v43, %v1006_v61  ;;  %v988_v32 = vsub.f32 %v2619_v53, %v972_v26  ;;  %1209 = vperm.xlu0 (%p1128_p3), %1978, %v1159_v46   ;;  %v1849_v21 = vpack.c.bf16 (%p1128_p3), %v1264_v47, %v1263_v31  ;;  %v1271_v1 = vld [vmem:[%s2811_s5 + $0x40] sm:$0xff] (%p1128_p3)  ;;  %v1164_v30 = vld [vmem:[%s2810_s4 + $0x68] sm:$0xff] (%p1128_p3)  ;;  %v1274_v61 = vld [vmem:[%s2811_s5 + $0x58] sm:$0xff] (%p1128_p3) }
 0x184   : > { %v1114_v6 = vpack.c.bf16 %v1103_v3, %v1102_v35  ;;  %v1038_v11 = vadd.f32 %v1022_v4, %v1004_v62  ;;  %v1025_v7 = vmul.f32 %v2527_v55, %v990_v57  ;;  %v1065_v34 = vpack.c.bf16 %v990_v57, %v989_v29  ;;  %v1156_v52 = vld [vmem:[%s2810_s4 + $0x28] sm:$0xff] (%p1128_p3)  ;;  %v1157_v41 = vld [vmem:[%s2810_s4 + $0x30] sm:$0xff] (%p1128_p3)  ;;  %v1275_v43 = vld [vmem:[%s2811_s5 + $0x60] sm:$0xff] (%p1128_p3) }
 0x185   : > { %1125 = vst [vmem:[%s2603_s28 + $0x28] sm:$0xff] %v1115_v5  ;;  %1056 = vst [vmem:[#allocation4 + $0x70] sm:$0xff] %v1040_v49  ;;  %v1023_v10 = vmul.f32 %v2527_v55, %v988_v32  ;;  %v1064_v18 = vpack.c.bf16 %v988_v32, %v987_v60  ;;  %v1152_v55 = vld [vmem:[%s2810_s4 + $0x8] sm:$0xff] (%p1128_p3)  ;;  %1850 = vmatprep.subr.bf16.mxu0 (%p1128_p3), %v1849_v21  ;;  %1897 = vmatprep.subr.bf16.mxu1 (%p1128_p3), %v1849_v21  ;;  %v1166_v2 = vld [vmem:[%s2810_s4 + $0x78] sm:$0xff] (%p1128_p3) }
 0x186   : > { %1124 = vst [vmem:[%s2603_s28 + $0x20] sm:$0xff] %v1114_v6  ;;  %1054 = vst [vmem:[#allocation4 + $0x60] sm:$0xff] %v1038_v11  ;;  %v1041_v23 = vadd.f32 %v1025_v7, %v1007_v38  ;;  %v1092_v48 = vunpack.c.l.bf16 %v1065_v34  ;;  %v1093_v20 = vunpack.c.h.bf16 %v1065_v34  ;;  %1174 = vperm.xlu1 (%p1128_p3), %1979, %v1152_v55   ;;  %1852 = vmatpush3.bf16.msra.mxu0 (%p1128_p3), %v1849_v21  ;;  %v1276_v62 = vld [vmem:[%s2811_s5 + $0x68] sm:$0xff] (%p1128_p3)  ;;  %v1158_v35 = vld [vmem:[%s2810_s4 + $0x38] sm:$0xff] (%p1128_p3) }
 0x187   : > { %1077 = vst [vmem:[%s2569_s10 + $0x38] sm:$0xff] %v1065_v34  ;;  %v1039_v9 = vadd.f32 %v1023_v10, %v1005_v8  ;;  %1076 = vst [vmem:[%s2569_s10 + $0x30] sm:$0xff] %v1064_v18  ;;  %v1090_v53 = vunpack.c.l.bf16 %v1064_v18  ;;  %v1091_v17 = vunpack.c.h.bf16 %v1064_v18  ;;  %1132 = sbr.rel (!%p1128_p3) target bundleno = 765 (0x2fd), region = 99  ;;  %1905 = vmatpush3.bf16.msra.mxu1 (%p1128_p3), %v1849_v21  ;;  %1179 = vperm.xlu0 (%p1128_p3), %1978, %v1153_v15   ;;  %v1277_v4 = vld [vmem:[%s2811_s5 + $0x70] sm:$0xff] (%p1128_p3)  ;;  %v1278_v26 = vld [vmem:[%s2811_s5 + $0x78] sm:$0xff] (%p1128_p3) }
 0x188   : > { %1057 = vst [vmem:[#allocation4 + $0x78] sm:$0xff] %v1041_v23  ;;  %v1108_v36 = vsub.f32 %v989_v29, %v1092_v48  ;;  %v1109_v24 = vsub.f32 %v990_v57, %v1093_v20  ;;  %1854 = vmatprep.subr.bf16.mxu0 (%p1128_p3), %v1853_v12  ;;  %1898 = vmatprep.subr.bf16.mxu1 (%p1128_p3), %v1853_v12  ;;  %v1272_v29 = vld [vmem:[%s2811_s5 + $0x48] sm:$0xff] (%p1128_p3)  ;;  %v1134_v57 = vld [vmem:[#allocation4] sm:$0xff] (%p1128_p3)  ;;  %v1144_v48 = vld [vmem:[#allocation4 + $0x50] sm:$0xff] (%p1128_p3) }
 0x189   : > { %1055 = vst [vmem:[#allocation4 + $0x68] sm:$0xff] %v1039_v9  ;;  %v1106_v28 = vsub.f32 %v987_v60, %v1090_v53  ;;  %v1107_v39 = vsub.f32 %v988_v32, %v1091_v17  ;;  %v1857_v13 = vpack.c.bf16 (%p1128_p3), %v1268_v16, %v1267_v50  ;;  %v1861_v0 = vpack.c.bf16 (%p1128_p3), %v1270_v44, %v1269_v45  ;;  %v1165_v60 = vld [vmem:[%s2810_s4 + $0x70] sm:$0xff] (%p1128_p3)  ;;  %v1135_v49 = vld [vmem:[#allocation4 + $0x8] sm:$0xff] (%p1128_p3)  ;;  %v1142_v34 = vld [vmem:[#allocation4 + $0x40] sm:$0xff] (%p1128_p3) }
 0x18a   : > { %v1117_v27 = vpack.c.bf16 %v1109_v24, %v1108_v36  ;;  %1214 = vperm.xlu1 (%p1128_p3), %1979, %v1160_v40   ;;  %1856 = vmatpush3.bf16.msra.mxu0 (%p1128_p3), %v1853_v12  ;;  %v1865_v58 = vpack.c.bf16 (%p1128_p3), %v1272_v29, %v1271_v1  ;;  %v1869_v37 = vpack.c.bf16 (%p1128_p3), %v1274_v61, %v1273_v59  ;;  %v1143_v7 = vld [vmem:[#allocation4 + $0x48] sm:$0xff] (%p1128_p3)  ;;  %v1136_v20 = vld [vmem:[#allocation4 + $0x10] sm:$0xff] (%p1128_p3)  ;;  %v1145_v24 = vld [vmem:[#allocation4 + $0x58] sm:$0xff] (%p1128_p3) }
 0x18b   : > { %v1116_v63 = vpack.c.bf16 %v1107_v39, %v1106_v28  ;;  %1906 = vmatpush3.bf16.msra.mxu1 (%p1128_p3), %v1853_v12  ;;  %1184 = vperm.xlu0 (%p1128_p3), %1978, %v1154_v14   ;;  %v1873_v3 = vpack.c.bf16 (%p1128_p3), %v1276_v62, %v1275_v43  ;;  %v1877_v5 = vpack.c.bf16 (%p1128_p3), %v1278_v26, %v1277_v4  ;;  %v1137_v28 = vld [vmem:[#allocation4 + $0x18] sm:$0xff] (%p1128_p3)  ;;  %v1138_v56 = vld [vmem:[#allocation4 + $0x20] sm:$0xff] (%p1128_p3)  ;;  %v1139_v42 = vld [vmem:[#allocation4 + $0x28] sm:$0xff] (%p1128_p3) }
 0x18c   : > { %1127 = vst [vmem:[%s2603_s28 + $0x38] sm:$0xff] %v1117_v27  ;;  %1858 = vmatprep.subr.bf16.mxu0 (%p1128_p3), %v1857_v13  ;;  %1899 = vmatprep.subr.bf16.mxu1 (%p1128_p3), %v1857_v13  ;;  %v1148_v50 = vld [vmem:[#allocation4 + $0x70] sm:$0xff] (%p1128_p3) }
 0x18d   : > { %1126 = vst [vmem:[%s2603_s28 + $0x30] sm:$0xff] %v1116_v63  ;;  %v1146_v19 = vld [vmem:[#allocation4 + $0x60] sm:$0xff] (%p1128_p3)  ;;  %v1140_v16 = vld [vmem:[#allocation4 + $0x30] sm:$0xff] (%p1128_p3) }
 0x18e   : > { %1219 = vperm.xlu1 %1979, %v1161_v25   ;;  %1860 = vmatpush3.bf16.msra.mxu0 %v1857_v13 }
 0x18f   : > { %1907 = vmatpush3.bf16.msra.mxu1 %v1857_v13  ;;  %1189 = vperm.xlu0 %1978, %v1155_v54   ;;  %v1149_v44 = vld [vmem:[#allocation4 + $0x78] sm:$0xff] }
 0x190   : > { %1862 = vmatprep.subr.bf16.mxu0 %v1861_v0  ;;  %1900 = vmatprep.subr.bf16.mxu1 %v1861_v0  ;;  %v1147_v21 = vld [vmem:[#allocation4 + $0x68] sm:$0xff] }
 0x192   : > { %1224 = vperm.xlu1 %1979, %v1162_v22   ;;  %1864 = vmatpush3.bf16.msra.mxu0 %v1861_v0 }
 0x193   : > { %1908 = vmatpush3.bf16.msra.mxu1 %v1861_v0  ;;  %1194 = vperm.xlu0 %1978, %v1156_v52  }
 0x194   : > { %1866 = vmatprep.subr.bf16.mxu0 %v1865_v58  ;;  %1901 = vmatprep.subr.bf16.mxu1 %v1865_v58 }
 0x196   : > { %1229 = vperm.xlu1 %1979, %v1163_v51   ;;  %1868 = vmatpush3.bf16.msra.mxu0 %v1865_v58  ;;  %v1141_v51 = vld [vmem:[#allocation4 + $0x38] sm:$0xff] }
 0x197   : > { %1909 = vmatpush3.bf16.msra.mxu1 %v1865_v58  ;;  %1199 = vperm.xlu0 %1978, %v1157_v41  }
 0x198   : > { %1870 = vmatprep.subr.bf16.mxu0 %v1869_v37  ;;  %1902 = vmatprep.subr.bf16.mxu1 %v1869_v37 }
 0x19a   : > { %1234 = vperm.xlu1 %1979, %v1164_v30   ;;  %1872 = vmatpush3.bf16.msra.mxu0 %v1869_v37 }
 0x19b   : > { %1910 = vmatpush3.bf16.msra.mxu1 %v1869_v37  ;;  %1204 = vperm.xlu0 %1978, %v1158_v35  }
 0x19c   : > { %1874 = vmatprep.subr.bf16.mxu0 %v1873_v3  ;;  %1903 = vmatprep.subr.bf16.mxu1 %v1873_v3 }
 0x19e   : > { %1239 = vperm.xlu1 %1979, %v1165_v60   ;;  %1876 = vmatpush3.bf16.msra.mxu0 %v1873_v3 }
 0x19f   : > { %1911 = vmatpush3.bf16.msra.mxu1 %v1873_v3  ;;  %1878 = vmatprep.subr.bf16.mxu0 %v1877_v5 }
 0x1a0   : > { %1904 = vmatprep.subr.bf16.mxu1 %v1877_v5 }
 0x1a2   : > { %1244 = vperm.xlu1 %1979, %v1166_v2   ;;  %1880 = vmatpush3.bf16.msra.mxu0 %v1877_v5 }
 0x1a3   : > { %1912 = vmatpush3.bf16.msra.mxu1 %v1877_v5 }
 0x1fe   : > { %v1170_v11 = vpop.permute.xlu0 %1169 }
 0x1ff   : > { %v1247_v32 = vmul.f32 %v1170_v11, %v1134_v57 }
 0x201   : > { %1825 = vmatprep.mubr.f32.mxu0 %v1247_v32 }
 0x202   : > { %v1210_v10 = vpop.permute.xlu0 %1209 }
 0x203   : > { %v1255_v23 = vmul.f32 %v1210_v10, %v1142_v34 }
 0x205   : > { %v1175_v6 = vpop.permute.xlu1 %1174  ;;  %1837 = vmatprep.mubr.f32.mxu1 %v1255_v23 }
 0x206   : > { %v1248_v38 = vmul.f32 %v1175_v6, %v1135_v49  ;;  %v1180_v53 = vpop.permute.xlu0 %1179 }
 0x207   : > { %v1249_v36 = vmul.f32 %v1180_v53, %v1136_v20 }
 0x208   : > { %1826 = vmatmul.mubr.f32.vlgmr.msra.gmra.mrb[0].mxu0 %v1248_v38 }
 0x209   : > { %v1215_v8 = vpop.permute.xlu1 %1214  ;;  %1828 = vmatprep.mubr.f32.mxu0 %v1249_v36 }
 0x20a   : > { %v1256_v18 = vmul.f32 %v1215_v8, %v1143_v7  ;;  %v1185_v27 = vpop.permute.xlu0 %1184 }
 0x20b   : > { %v1250_v55 = vmul.f32 %v1185_v27, %v1137_v28 }
 0x20c   : > { %1838 = vmatmul.mubr.f32.vlgmr.msra.gmra.mrb[0].mxu1 %v1256_v18 }
 0x20d   : > { %v1220_v9 = vpop.permute.xlu1 %1219  ;;  %1829 = vmatmul.mubr.f32.gmra.mrb[2].mxu0 %v1250_v55 }
 0x20e   : > { %v1257_v17 = vmul.f32 %v1220_v9, %v1144_v48  ;;  %v1190_v46 = vpop.permute.xlu0 %1189 }
 0x20f   : > { %v1251_v47 = vmul.f32 %v1190_v46, %v1138_v56 }
 0x210   : > { %1840 = vmatprep.mubr.f32.mxu1 %v1257_v17 }
 0x211   : > { %v1225_v39 = vpop.permute.xlu1 %1224  ;;  %1831 = vmatprep.mubr.f32.mxu0 %v1251_v47 }
 0x212   : > { %v1258_v63 = vmul.f32 %v1225_v39, %v1145_v24  ;;  %v1195_v25 = vpop.permute.xlu0 %1194 }
 0x213   : > { %v1252_v12 = vmul.f32 %v1195_v25, %v1139_v42 }
 0x214   : > { %1841 = vmatmul.mubr.f32.gmra.mrb[2].mxu1 %v1258_v63 }
 0x215   : > { %v1230_v40 = vpop.permute.xlu1 %1229  ;;  %1832 = vmatmul.mubr.f32.gmra.mrb[4].mxu0 %v1252_v12 }
 0x216   : > { %v1259_v31 = vmul.f32 %v1230_v40, %v1146_v19  ;;  %v1200_v14 = vpop.permute.xlu0 %1199 }
 0x217   : > { %v1253_v45 = vmul.f32 %v1200_v14, %v1140_v16 }
 0x218   : > { %1843 = vmatprep.mubr.f32.mxu1 %v1259_v31 }
 0x219   : > { %v1235_v33 = vpop.permute.xlu1 %1234  ;;  %1834 = vmatprep.mubr.f32.mxu0 %v1253_v45 }
 0x21a   : > { %v1260_v15 = vmul.f32 %v1235_v33, %v1147_v21  ;;  %v1205_v0 = vpop.permute.xlu0 %1204 }
 0x21b   : > { %v1254_v29 = vmul.f32 %v1205_v0, %v1141_v51 }
 0x21c   : > { %1844 = vmatmul.mubr.f32.gmra.mrb[4].mxu1 %v1260_v15 }
 0x21d   : > { %v1240_v22 = vpop.permute.xlu1 %1239  ;;  %1835 = vmatmul.mubr.f32.gmra.mrb[6].mxu0 %v1254_v29 }
 0x21e   : > { %v1261_v13 = vmul.f32 %v1240_v22, %v1148_v50 }
 0x220   : > { %1846 = vmatprep.mubr.f32.mxu1 %v1261_v13 }
 0x221   : > { %v1245_v54 = vpop.permute.xlu1 %1244 }
 0x222   : > { %v1262_v1 = vmul.f32 %v1245_v54, %v1149_v44 }
 0x224   : > { %1847 = vmatmul.mubr.f32.gmra.mrb[6].mxu1 %v1262_v1 }
 0x2db   : > { %v1827_v30 = vpop.f32.mrb[0].mxu0 }
 0x2dc   : > { %vm1425_vm0 = vcmp.ge.f32.partialorder %v1827_v30, 0.0  ;;  %v1441_v52 = vmul.f32 0.01, %v1827_v30  ;;  %v1345_v58 = vpop.f32.mrb[1].mxu0 }
 0x2dd   : > { %vm1424_vm1 = vcmp.ge.f32.partialorder %v1345_v58, 0.0  ;;  %v1440_v59 = vmul.f32 0.01, %v1345_v58 }
 0x2de   : > { %v1457_v61 = vsel %vm1425_vm0, %v1827_v30, %v1441_v52 }
 0x2df   : > { %1473 = vst [vmem:[#allocation11 + $0x8] sm:$0xff] %v1457_v61  ;;  %v1456_v60 = vsel %vm1424_vm1, %v1345_v58, %v1440_v59  ;;  %v1839_v41 = vpop.f32.mrb[0].mxu1 }
 0x2e0   : > { %1472 = vst [vmem:[#allocation11] sm:$0xff] %v1456_v60  ;;  %vm1433_vm2 = vcmp.ge.f32.partialorder %v1839_v41, 0.0  ;;  %v1449_v37 = vmul.f32 0.01, %v1839_v41  ;;  %v1385_v43 = vpop.f32.mrb[1].mxu1  ;;  %v1830_v3 = vpop.f32.mrb[2].mxu0 }
 0x2e1   : > { %vm1432_vm3 = vcmp.ge.f32.partialorder %v1385_v43, 0.0  ;;  %v1448_v62 = vmul.f32 0.01, %v1385_v43  ;;  %vm1427_vm4 = vcmp.ge.f32.partialorder %v1830_v3, 0.0  ;;  %v1443_v26 = vmul.f32 0.01, %v1830_v3 }
 0x2e2   : > { %v1465_v2 = vsel %vm1433_vm2, %v1839_v41, %v1449_v37  ;;  %v1355_v49 = vpop.f32.mrb[3].mxu0 }
 0x2e3   : > { %1481 = vst [vmem:[#allocation11 + $0x48] sm:$0xff] %v1465_v2  ;;  %v1464_v35 = vsel %vm1432_vm3, %v1385_v43, %v1448_v62  ;;  %v1459_v6 = vsel %vm1427_vm4, %v1830_v3, %v1443_v26  ;;  %vm1426_vm6 = vcmp.ge.f32.partialorder %v1355_v49, 0.0  ;;  %v1442_v38 = vmul.f32 0.01, %v1355_v49 }
 0x2e4   : > { %1480 = vst [vmem:[#allocation11 + $0x40] sm:$0xff] %v1464_v35  ;;  %1475 = vst [vmem:[#allocation11 + $0x18] sm:$0xff] %v1459_v6 }
 0x2e5   : > { %v1458_v7 = vsel %vm1426_vm6, %v1355_v49, %v1442_v38 }
 0x2e6   : > { %1474 = vst [vmem:[#allocation11 + $0x10] sm:$0xff] %v1458_v7 }
 0x2e7   : > { %v1842_v4 = vpop.f32.mrb[2].mxu1 }
 0x2e8   : > { %vm1435_vm5 = vcmp.ge.f32.partialorder %v1842_v4, 0.0  ;;  %v1451_v5 = vmul.f32 0.01, %v1842_v4  ;;  %v1395_v57 = vpop.f32.mrb[3].mxu1  ;;  %v1833_v8 = vpop.f32.mrb[4].mxu0 }
 0x2e9   : > { %vm1434_vm7 = vcmp.ge.f32.partialorder %v1395_v57, 0.0  ;;  %v1450_v32 = vmul.f32 0.01, %v1395_v57  ;;  %vm1429_vm8 = vcmp.ge.f32.partialorder %v1833_v8, 0.0  ;;  %v1445_v18 = vmul.f32 0.01, %v1833_v8 }
 0x2ea   : > { %v1467_v11 = vsel %vm1435_vm5, %v1842_v4, %v1451_v5  ;;  %v1365_v48 = vpop.f32.mrb[5].mxu0 }
 0x2eb   : > { %1483 = vst [vmem:[#allocation11 + $0x58] sm:$0xff] %v1467_v11  ;;  %v1466_v34 = vsel %vm1434_vm7, %v1395_v57, %v1450_v32  ;;  %v1461_v9 = vsel %vm1429_vm8, %v1833_v8, %v1445_v18  ;;  %vm1428_vm10 = vcmp.ge.f32.partialorder %v1365_v48, 0.0  ;;  %v1444_v17 = vmul.f32 0.01, %v1365_v48 }
 0x2ec   : > { %1482 = vst [vmem:[#allocation11 + $0x50] sm:$0xff] %v1466_v34  ;;  %1477 = vst [vmem:[#allocation11 + $0x28] sm:$0xff] %v1461_v9 }
 0x2ed   : > { %v1460_v24 = vsel %vm1428_vm10, %v1365_v48, %v1444_v17 }
 0x2ee   : > { %1476 = vst [vmem:[#allocation11 + $0x20] sm:$0xff] %v1460_v24 }
 0x2ef   : > { %v1845_v10 = vpop.f32.mrb[4].mxu1 }
 0x2f0   : > { %vm1437_vm9 = vcmp.ge.f32.partialorder %v1845_v10, 0.0  ;;  %v1453_v23 = vmul.f32 0.01, %v1845_v10  ;;  %v1405_v20 = vpop.f32.mrb[5].mxu1  ;;  %v1836_v39 = vpop.f32.mrb[6].mxu0 }
 0x2f1   : > { %vm1436_vm11 = vcmp.ge.f32.partialorder %v1405_v20, 0.0  ;;  %v1452_v36 = vmul.f32 0.01, %v1405_v20  ;;  %vm1431_vm12 = vcmp.ge.f32.partialorder %v1836_v39, 0.0  ;;  %v1447_v63 = vmul.f32 0.01, %v1836_v39 }
 0x2f2   : > { %v1469_v53 = vsel %vm1437_vm9, %v1845_v10, %v1453_v23  ;;  %v1375_v19 = vpop.f32.mrb[7].mxu0 }
 0x2f3   : > { %1485 = vst [vmem:[#allocation11 + $0x68] sm:$0xff] %v1469_v53  ;;  %v1468_v28 = vsel %vm1436_vm11, %v1405_v20, %v1452_v36  ;;  %v1463_v40 = vsel %vm1431_vm12, %v1836_v39, %v1447_v63  ;;  %vm1430_vm14 = vcmp.ge.f32.partialorder %v1375_v19, 0.0  ;;  %v1446_v31 = vmul.f32 0.01, %v1375_v19 }
 0x2f4   : > { %1484 = vst [vmem:[#allocation11 + $0x60] sm:$0xff] %v1468_v28  ;;  %1479 = vst [vmem:[#allocation11 + $0x38] sm:$0xff] %v1463_v40 }
 0x2f5   : > { %v1462_v21 = vsel %vm1430_vm14, %v1375_v19, %v1446_v31 }
 0x2f6   : > { %1478 = vst [vmem:[#allocation11 + $0x30] sm:$0xff] %v1462_v21 }
 0x2f7   : > { %v1848_v27 = vpop.f32.mrb[6].mxu1 }
 0x2f8   : > { %vm1439_vm13 = vcmp.ge.f32.partialorder %v1848_v27, 0.0  ;;  %v1455_v55 = vmul.f32 0.01, %v1848_v27  ;;  %v1415_v56 = vpop.f32.mrb[7].mxu1 }
 0x2f9   : > { %vm1438_vm15 = vcmp.ge.f32.partialorder %v1415_v56, 0.0  ;;  %v1454_v47 = vmul.f32 0.01, %v1415_v56 }
 0x2fa   : > { %v1471_v46 = vsel %vm1439_vm13, %v1848_v27, %v1455_v55 }
 0x2fb   : > { %1487 = vst [vmem:[#allocation11 + $0x78] sm:$0xff] %v1471_v46  ;;  %v1470_v42 = vsel %vm1438_vm15, %v1415_v56, %v1454_v47 }
 0x2fc   : > { %1486 = vst [vmem:[#allocation11 + $0x70] sm:$0xff] %v1470_v42 }
 0x2fd PF: > { %p2772_p4 = scmp.eq.s32.totalorder %s1633_s24, 1  ;;  %s2093_s19 = smov [#allocation11]  }
 0x2fe   : > { %s1504_s20 = sshll.u32 %s2093_s19, 4  ;;  %s1505_s20 = int_to_ptr.vmem [resolvable:$true] %s1504_s20 }
 0x2ff   : > { %s2023_s29 = scalar_lea.vmem %s1505_s20, 2048  ;;  %s2029_s30 = scalar_lea.vmem %s1505_s20, 4096 }
 0x300   : > { %p2024_p6 = scmp.ne.s32.totalorder %s1505_s20, %s2023_s29  ;;  %p2030_p9 = scmp.lt.s32.totalorder %s1505_s20, %s1505_s20 }
 0x301   : > { %p2031_p10 = scmp.lt.s32.totalorder %s2029_s30, %s2023_s29 }
 0x302   : > { %p2025_p5 = pnand %p2024_p6, %p2772_p4 }
 0x303   : > { %p2032_p11 = por %p2031_p10, %p2030_p9 }
 0x304   : > { %p2026_p7 = pneg %p2025_p5 }
 0x306   : > { %p2033_p12 = pnand %p2032_p11, %p2026_p7 }
 0x308   : > { %2036 = shalt.err (!%p2033_p12)
}
 0x309   : > { %s2037_s11 = scalar_lea.hbm %s2812_s6, 2048 }
 0x30a   : > { %p2038_p13 = scmp.ne.s32.totalorder %s2812_s6, %s2037_s11  ;;  %p2043_p2 = scmp.lt.u32.totalorder %s2037_s11, %s2812_s6 }
 0x30c   : > { %p2039_p0 = pnand %p2038_p13, %p2772_p4 }
 0x30e   : > { %p2040_p1 = pneg %p2039_p0 }
 0x310   : > { %p2045_p8 = pnand %p2043_p2, %p2040_p1 }
 0x312   : > { %2048 = shalt.err (!%p2045_p8)
}
 0x313   : > { %s2094_s28 = smov 128   ;;  %s2095_s13 = smov 8  }
 0x314   : > { %1922 = dma.vmem_to_hbm [thread:$0]  (%p2772_p4), %s1505_s20, 2048, %s2812_s6, [#allocation8], %s2094_s28, %s2094_s28, %s2095_s13  }
 0x315 PF: > { %p1941_p3 = scmp.ge.s32.totalorder %s2085_s23, 2  ;;  %p1942_p6 = scmp.eq.s32.totalorder %s1634_s25, 1 }
 0x317   : > { %p1933_p5 = pnand %p1942_p6, %p1941_p3 }
 0x319   : > { %2072 = dma.done.wait (!%p1933_p5), [#allocation8], 2048  }
 0x31a   : > { %2074 = vsyncadd (!%p1933_p5), [#allocation8], 4294965248  ;;  %s21_s23 = sadd.s32 1, %s2085_s23   ;;  %s2817_s21 = smov %s2081_s22 }
 0x31b   : > { %p18_p7 = scmp.ge.s32.totalorder %s21_s23, 4   ;;  %s2818_s22 = smov %s2820_s26 }
 0x31d   :  { %20 = sbr.rel (!%p18_p7) target bundleno = 5 (0x5), region = 152 }
 0x324   :  { %1525 = vsyncpa [#allocation7], 1 }
 0x325   :  { %1527 = vsyncpa [#allocation7 + $0x1], 1 }
 0x326   :  { %1528 = vsyncpa [#allocation8], 1 }
 0x327   :  { %1530 = vsyncpa [#allocation8 + $0x1], 1 }
 0x328   :  { %1531 = vsyncpa [#allocation9], 1 }
 0x329   :  { %1533 = vsyncpa [#allocation9 + $0x1], 1 }

</bundles_post_ra>
